<compile_context>
chip_gen: v7x
topology: tpu7x:2x2x1
jax: 0.10.0
libtpu: 0.0.40
codegen_flags: <defaults>
</compile_context>

<pallas_src>
import functools
import math

import numpy as np
import jax
import jax.numpy as jnp
from jax.experimental import pallas as pl
from jax.experimental.pallas import tpu as pltpu


# ----------------------------------------------------------------------------
# Pallas kernel
# ----------------------------------------------------------------------------
def _mha_block_kernel(x_ref, wq_ref, bq_ref, wk_ref, bk_ref, wv_ref, bv_ref,
                      wo_ref, bo_ref, out_ref, attn_ref, *, num_heads, n_real):
    """One grid step = multi-head self-attention over a block of instances."""
    bn, L, E = x_ref.shape
    H = num_heads
    dh = E // H
    lanes = attn_ref.shape[-1]

    x2 = x_ref[...].reshape(bn * L, E)                    # bf16, (bn*L, E)

    def proj(w_ref, b_ref):
        return (jnp.dot(x2, w_ref[...], preferred_element_type=jnp.float32)
                + b_ref[...])

    q = proj(wq_ref, bq_ref)      # 1/sqrt(dh) folded into wq/bq at pack time
    k = proj(wk_ref, bk_ref)
    v = proj(wv_ref, bv_ref)

    def heads(t):                 # (bn*L, E) -> (bn*H, L, dh)
        return jnp.swapaxes(t.reshape(bn, L, H, dh), 1, 2).reshape(bn * H, L, dh)

    qh, kh, vh = heads(q), heads(k), heads(v)

    # Batched over (instance, head): two dot_generals instead of 2H tiny ones.
    s = jnp.einsum('bld,bmd->blm', qh, kh,
                   preferred_element_type=jnp.float32)    # (bn*H, L, L)
    m = jnp.max(s, axis=-1, keepdims=True)
    e = jnp.exp(s - m)
    denom = jnp.sum(e, axis=-1, keepdims=True)
    p = e * pl.reciprocal(denom, approx=False)            # exact softmax rows

    ctx = jnp.einsum('blm,bmd->bld', p, vh,
                     preferred_element_type=jnp.float32)  # (bn*H, L, dh)
    ctx = jnp.swapaxes(ctx.reshape(bn, H, L, dh), 1, 2).reshape(bn * L, E)

    out = (jnp.dot(ctx.astype(jnp.bfloat16), wo_ref[...],
                   preferred_element_type=jnp.float32) + bo_ref[...])
    out_ref[...] = out.reshape(bn, L, E).astype(out_ref.dtype)

    # Partial attention-weight sum over (real instances in this block, heads).
    inst = (pl.program_id(0) * bn
            + jax.lax.broadcasted_iota(jnp.int32, (bn, 1, 1, 1), 0))
    valid = inst < n_real                                  # mask padded instances
    p4 = p.reshape(bn, H, L, L)
    attn_sum = jnp.sum(jnp.where(valid, p4, 0.0), axis=(0, 1))   # (L, L)
    if lanes > L:   # lane-dense store (unmasked vst)
        attn_sum = jnp.concatenate(
            [attn_sum, jnp.zeros((L, lanes - L), jnp.float32)], axis=-1)
    attn_ref[0] = attn_sum.astype(attn_ref.dtype)


# ----------------------------------------------------------------------------
# Blocking / hardware heuristics
# ----------------------------------------------------------------------------
@functools.lru_cache(maxsize=None)
def _tpu_defaults():
    vmem_cap = 64 << 20          # conservative default: v7x per-TC VMEM
    num_tc = 1
    get_info = getattr(pltpu, "get_tpu_info", None)
    if get_info is not None:
        try:
            info = get_info()
            vmem_cap = int(getattr(info, "vmem_capacity_bytes", vmem_cap))
            for attr in ("num_cores", "core_count", "num_tensorcores"):
                val = getattr(info, attr, None)
                if val:
                    num_tc = int(val)
                    break
        except Exception:
            pass
    return vmem_cap, num_tc


def _choose_blocking(N, L, E, num_heads):
    """Pick instances-per-grid-step (block_n) and padded instance count."""
    vmem_cap, num_tc = _tpu_defaults()
    # Real per-instance per-step footprint (bytes):
    per_inst = (2 * L * E * 2                  # x block (bf16, double-buffered)
                + 2 * L * E * 4                # out block (f32, double-buffered)
                + 3 * L * E * 4                # q, k, v (f32)
                + 3 * num_heads * L * L * 4    # s, e, p (f32)
                + 2 * L * E * 4)               # ctx + projected-out temporaries
    budget = max(per_inst, vmem_cap // 4)      # headroom for weights/attn/pipeline
    max_bn = max(1, budget // per_inst)

    if num_tc <= 1:
        # Single TensorCore: grid is a serial loop -> biggest block that fits.
        block_n = max(1, min(N, max_bn))
    else:
        # Split the "parallel" axis evenly across TensorCores.
        block_n = max(1, min(max_bn, -(-N // num_tc)))

    nblocks = -(-N // block_n)
    if num_tc > 1 and nblocks % num_tc:
        nblocks = -(-nblocks // num_tc) * num_tc   # balanced step count per TC
    return block_n, nblocks * block_n


# ----------------------------------------------------------------------------
# pallas_call wrapper
# ----------------------------------------------------------------------------
def _mha_over_instances(x_inst, params, *, num_heads, n_real, block_n, out_dtype):
    """x_inst: (N_pad, L, E) bf16 -> (out (N_pad,L,E), attn partials (nblocks,L,lanes))."""
    N_pad, L, E = x_inst.shape
    nblocks = N_pad // block_n
    lanes = -(-L // 128) * 128                    # lane-dense attn output
    wq, bq, wk, bk, wv, bv, wo, bo = params
    vmem_cap, _ = _tpu_defaults()

    full = lambda shape: pl.BlockSpec(shape, lambda i: (0,) * len(shape))
    kernel = functools.partial(_mha_block_kernel, num_heads=num_heads, n_real=n_real)

    return pl.pallas_call(
        kernel,
        grid=(nblocks,),
        in_specs=[
            pl.BlockSpec((block_n, L, E), lambda i: (i, 0, 0)),   # x block
            full((E, E)), full((1, E)),                           # Wq, bq
            full((E, E)), full((1, E)),                           # Wk, bk
            full((E, E)), full((1, E)),                           # Wv, bv
            full((E, E)), full((1, E)),                           # Wo, bo
        ],
        out_specs=[
            pl.BlockSpec((block_n, L, E), lambda i: (i, 0, 0)),
            pl.BlockSpec((1, L, lanes), lambda i: (i, 0, 0)),
        ],
        out_shape=[
            jax.ShapeDtypeStruct((N_pad, L, E), out_dtype),
            jax.ShapeDtypeStruct((nblocks, L, lanes), jnp.float32),
        ],
        compiler_params=pltpu.CompilerParams(
            dimension_semantics=("parallel",),
            vmem_limit_bytes=int(vmem_cap // 2)),
    )(x_inst, wq, bq, wk, bk, wv, bv, wo, bo)


def _pack_mha_params(mha_params, num_heads):
    """Fold 1/sqrt(head_dim) into Wq/bq; weights -> bf16 (MXU-native), biases f32."""
    wq, bq, wk, bk, wv, bv, wo, bo = mha_params   # weights already (E_in, E_out)
    E = wq.shape[0]
    assert E % num_heads == 0
    scale = 1.0 / math.sqrt(E // num_heads)
    w16 = lambda w: jnp.asarray(w, jnp.float32).astype(jnp.bfloat16)
    f32 = lambda b: jnp.asarray(b, jnp.float32)
    return (w16(wq * scale), f32(bq * scale), w16(wk), f32(bk),
            w16(wv), f32(bv), w16(wo), f32(bo))


@functools.partial(jax.jit, static_argnames=("num_heads", "n_real", "block_n"))
def _intra_cluster_core(x, gather_idx, inv_perm,
                        wq, bq, wk, bk, wv, bv, wo, bo,
                        *, num_heads, n_real, block_n):
    B, A, E = x.shape
    N_pad, L = gather_idx.shape

    # Single vectorized gather of all (padded) instances; cast to bf16 first so
    # the pre-kernel HBM round-trip moves half the bytes.
    # TODO(synk): for very large N, gather rows inside the kernel via scalar
    # prefetch + manual DMA to remove this round-trip entirely.
    x_flat = x.reshape(B * A, E).astype(jnp.bfloat16)
    x_inst = jnp.take(x_flat, gather_idx.reshape(-1), axis=0).reshape(N_pad, L, E)

    out_inst, attn_blocks = _mha_over_instances(
        x_inst, (wq, bq, wk, bk, wv, bv, wo, bo),
        num_heads=num_heads, n_real=n_real, block_n=block_n, out_dtype=x.dtype)

    # Inverse-permutation gather (every agent appears in exactly one real
    # instance): avoids a TPU scatter and the zeros-init write.
    out_flat = jnp.take(out_inst.reshape(N_pad * L, E), inv_perm, axis=0)
    output = out_flat.reshape(B, A, E)

    # cat over instances then mean(dim=0) == sum over (instances, heads)/(N*H).
    attention_weights = jnp.sum(attn_blocks, axis=0)[:, :L] / (n_real * num_heads)
    return output, attention_weights


def intra_cluster_attention(x, cluster_assignments, positions, params, num_heads):
    """Reproduces IntraClusterAttention.forward (eval mode).

    x:                   (B, A, E) float32
    cluster_assignments: (B, A)    int32
    positions:           (B, A, 3) float32 or None
    Returns (output (B, A, E), attention_weights (L, L)).
    """
    mha_params, _pos_w, _pos_b = params
    B, A, E = x.shape

    # Host-side, data-dependent grouping of agents into (cluster, batch)
    # instances (mirrors the python loops of the reference; not jittable).
    ca = np.asarray(cluster_assignments)
    rows = []
    for cid in np.unique(ca):
        for b in range(B):
            idx = np.where(ca[b] == cid)[0]
            if len(idx) > 0:
                rows.append(b * A + idx)

    if not rows:
        return jnp.zeros_like(x), jnp.zeros((A, A), jnp.float32)

    sizes = {len(r) for r in rows}
    assert len(sizes) == 1, (
        "reference torch.cat over per-cluster weights requires equal cluster sizes")
    L = sizes.pop()
    N = len(rows)
    flat_rows = np.concatenate(rows)
    assert np.array_equal(np.sort(flat_rows), np.arange(B * A)), (
        "every agent must belong to exactly one cluster instance")

    block_n, n_pad = _choose_blocking(N, L, E, num_heads)
    gather_idx = np.zeros((n_pad, L), np.int32)            # pad with row 0 (masked)
    gather_idx[:N] = np.stack(rows).astype(np.int32)
    inv_perm = np.empty(B * A, np.int32)
    inv_perm[flat_rows] = np.arange(N * L, dtype=np.int32)

    # Note: the reference computes position_encoding(rel_pos) and discards it;
    # that dead compute is intentionally omitted (no effect on outputs).

    packed = _pack_mha_params(mha_params, num_heads)
    return _intra_cluster_core(
        x, jnp.asarray(gather_idx), jnp.asarray(inv_perm), *packed,
        num_heads=num_heads, n_real=N, block_n=block_n)


# ----------------------------------------------------------------------------
# Params + pure-numpy reference (for the self-check in __main__)
# ----------------------------------------------------------------------------
def init_params(key, embed_dim, num_heads):
    ks = jax.random.split(key, 10)
    E = embed_dim
    scl = 0.05
    # PyTorch Linear stores W as (out, in); kernel consumes x @ W, so pre-transpose.
    wq = jax.random.normal(ks[0], (E, E), jnp.float32) * scl
    wk = jax.random.normal(ks[1], (E, E), jnp.float32) * scl
    wv = jax.random.normal(ks[2], (E, E), jnp.float32) * scl
    wo = jax.random.normal(ks[3], (E, E), jnp.float32) * scl
    bq = jax.random.normal(ks[4], (1, E), jnp.float32) * scl
    bk = jax.random.normal(ks[5], (1, E), jnp.float32) * scl
    bv = jax.random.normal(ks[6], (1, E), jnp.float32) * scl
    bo = jax.random.normal(ks[7], (1, E), jnp.float32) * scl
    mha_params = (wq.T, bq, wk.T, bk, wv.T, bv, wo.T, bo)
    pos_w = jax.random.normal(ks[8], (E // 4, 3), jnp.float32) * scl   # nn.Linear(3, E//4)
    pos_b = jax.random.normal(ks[9], (E // 4,), jnp.float32) * scl
    return mha_params, pos_w, pos_b


def _reference_forward(x, cluster_assignments, params, num_heads):
    """Pure-numpy (f64) mirror of the PyTorch forward, for a sanity check."""
    mha_params, _, _ = params
    wq, bq, wk, bk, wv, bv, wo, bo = [np.asarray(p, np.float64) for p in mha_params]
    x_np = np.asarray(x, np.float64)
    ca = np.asarray(cluster_assignments)
    B, A, E = x_np.shape
    H = num_heads
    dh = E // H
    out = np.zeros_like(x_np)
    weights = []
    for cid in np.unique(ca):
        for b in range(B):
            idx = np.where(ca[b] == cid)[0]
            if len(idx) == 0:
                continue
            L = len(idx)
            xc = x_np[b, idx]
            q = xc @ wq + bq[0]
            k = xc @ wk + bk[0]
            v = xc @ wv + bv[0]
            qh = q.reshape(L, H, dh).transpose(1, 0, 2)
            kh = k.reshape(L, H, dh).transpose(1, 0, 2)
            vh = v.reshape(L, H, dh).transpose(1, 0, 2)
            s = qh @ kh.transpose(0, 2, 1) / np.sqrt(dh)
            s = s - s.max(-1, keepdims=True)
            p = np.exp(s)
            p = p / p.sum(-1, keepdims=True)
            ctx = (p @ vh).transpose(1, 0, 2).reshape(L, E)
            out[b, idx] = ctx @ wo + bo[0]
            weights.append(p.mean(0))          # head-averaged (L, L)
    attn = np.mean(np.stack(weights), axis=0)
    return out, attn


if __name__ == "__main__":
    key = jax.random.PRNGKey(0)
    batch, num_agents, embed_dim, num_heads, cluster_size = 2, 16, 32, 4, 8
    num_clusters = num_agents // cluster_size

    k_x, k_pos, k_par = jax.random.split(key, 3)
    x = jax.random.normal(k_x, (batch, num_agents, embed_dim), jnp.float32)
    positions = jax.random.normal(k_pos, (batch, num_agents, 3), jnp.float32)

    # Equal-size clusters (required by the reference's torch.cat over weights).
    base = np.repeat(np.arange(num_clusters), cluster_size)
    rng = np.random.default_rng(0)
    cluster_assignments = np.stack(
        [rng.permutation(base) for _ in range(batch)]).astype(np.int32)

    params = init_params(k_par, embed_dim, num_heads)

    output, attn_weights = intra_cluster_attention(
        x, cluster_assignments, positions, params, num_heads)
    jax.block_until_ready((output, attn_weights))

    assert output.shape == (batch, num_agents, embed_dim)
    assert attn_weights.shape == (cluster_size, cluster_size)
    assert bool(jnp.all(jnp.isfinite(output)))
    assert bool(jnp.all(jnp.isfinite(attn_weights)))

    # Numerical sanity vs. a pure-numpy mirror of the PyTorch forward
    # (tolerances account for the bf16 matmul inputs inside the kernel).
    ref_out, ref_attn = _reference_forward(x, cluster_assignments, params, num_heads)
    np.testing.assert_allclose(np.asarray(output), ref_out, atol=3e-2, rtol=3e-2)
    np.testing.assert_allclose(np.asarray(attn_weights), ref_attn, atol=1e-2, rtol=1e-2)

    print("KERNEL_OK")
</pallas_src>

<mosaic_0001>
module attributes {stable_mosaic.version = 11 : i64} {
  func.func @_mha_block_kernel(%arg0: i32, %arg1: memref<4x8x32xbf16, #tpu.memory_space<vmem>>, %arg2: memref<32x32xbf16, #tpu.memory_space<vmem>>, %arg3: memref<1x32xf32, #tpu.memory_space<vmem>>, %arg4: memref<32x32xbf16, #tpu.memory_space<vmem>>, %arg5: memref<1x32xf32, #tpu.memory_space<vmem>>, %arg6: memref<32x32xbf16, #tpu.memory_space<vmem>>, %arg7: memref<1x32xf32, #tpu.memory_space<vmem>>, %arg8: memref<32x32xbf16, #tpu.memory_space<vmem>>, %arg9: memref<1x32xf32, #tpu.memory_space<vmem>>, %arg10: memref<4x8x32xf32, #tpu.memory_space<vmem>>, %arg11: memref<1x8x128xf32, #tpu.memory_space<vmem>>) attributes {dimension_semantics = [#tpu.dimension_semantics<parallel>], iteration_bounds = array<i64: 1>, scalar_prefetch = 0 : i64, scratch_operands = 0 : i64, tpu.core_type = #tpu.core_type<tc>, window_params = [{transform_indices = @transform_0, window_bounds = array<i64: 4, 8, 32>}, {pipeline_mode = #tpu.pipeline_mode<synchronous>, transform_indices = @transform_1, window_bounds = array<i64: 32, 32>}, {pipeline_mode = #tpu.pipeline_mode<synchronous>, transform_indices = @transform_2, window_bounds = array<i64: 1, 32>}, {pipeline_mode = #tpu.pipeline_mode<synchronous>, transform_indices = @transform_3, window_bounds = array<i64: 32, 32>}, {pipeline_mode = #tpu.pipeline_mode<synchronous>, transform_indices = @transform_4, window_bounds = array<i64: 1, 32>}, {pipeline_mode = #tpu.pipeline_mode<synchronous>, transform_indices = @transform_5, window_bounds = array<i64: 32, 32>}, {pipeline_mode = #tpu.pipeline_mode<synchronous>, transform_indices = @transform_6, window_bounds = array<i64: 1, 32>}, {pipeline_mode = #tpu.pipeline_mode<synchronous>, transform_indices = @transform_7, window_bounds = array<i64: 32, 32>}, {pipeline_mode = #tpu.pipeline_mode<synchronous>, transform_indices = @transform_8, window_bounds = array<i64: 1, 32>}, {transform_indices = @transform_9, window_bounds = array<i64: 4, 8, 32>}, {transform_indices = @transform_10, window_bounds = array<i64: 1, 8, 128>}]} {
    %c0 = arith.constant 0 : index
    %c0_0 = arith.constant 0 : index
    %c0_1 = arith.constant 0 : index
    %0 = vector.load %arg1[%c0, %c0_0, %c0_1] : memref<4x8x32xbf16, #tpu.memory_space<vmem>>, vector<4x8x32xbf16>
    %1 = vector.shape_cast %0 : vector<4x8x32xbf16> to vector<32x32xbf16>
    %c0_2 = arith.constant 0 : index
    %c0_3 = arith.constant 0 : index
    %2 = vector.load %arg2[%c0_2, %c0_3] : memref<32x32xbf16, #tpu.memory_space<vmem>>, vector<32x32xbf16>
    %cst = arith.constant dense<0.000000e+00> : vector<32x32xf32>
    %3 = tpu.matmul %1, %2, %cst {dimension_numbers = #tpu.dot_dimension_numbers<[1], [0], [0], [1], [0, 0, 1, 1], [], []>} : vector<32x32xbf16>, vector<32x32xbf16>, vector<32x32xf32> -> vector<32x32xf32>
    %c0_4 = arith.constant 0 : index
    %c0_5 = arith.constant 0 : index
    %4 = vector.load %arg3[%c0_4, %c0_5] : memref<1x32xf32, #tpu.memory_space<vmem>>, vector<1x32xf32>
    %5 = vector.broadcast %4 : vector<1x32xf32> to vector<32x32xf32>
    %6 = arith.addf %3, %5 : vector<32x32xf32>
    %c0_6 = arith.constant 0 : index
    %c0_7 = arith.constant 0 : index
    %7 = vector.load %arg4[%c0_6, %c0_7] : memref<32x32xbf16, #tpu.memory_space<vmem>>, vector<32x32xbf16>
    %cst_8 = arith.constant dense<0.000000e+00> : vector<32x32xf32>
    %8 = tpu.matmul %1, %7, %cst_8 {dimension_numbers = #tpu.dot_dimension_numbers<[1], [0], [0], [1], [0, 0, 1, 1], [], []>} : vector<32x32xbf16>, vector<32x32xbf16>, vector<32x32xf32> -> vector<32x32xf32>
    %c0_9 = arith.constant 0 : index
    %c0_10 = arith.constant 0 : index
    %9 = vector.load %arg5[%c0_9, %c0_10] : memref<1x32xf32, #tpu.memory_space<vmem>>, vector<1x32xf32>
    %10 = vector.broadcast %9 : vector<1x32xf32> to vector<32x32xf32>
    %11 = arith.addf %8, %10 : vector<32x32xf32>
    %c0_11 = arith.constant 0 : index
    %c0_12 = arith.constant 0 : index
    %12 = vector.load %arg6[%c0_11, %c0_12] : memref<32x32xbf16, #tpu.memory_space<vmem>>, vector<32x32xbf16>
    %cst_13 = arith.constant dense<0.000000e+00> : vector<32x32xf32>
    %13 = tpu.matmul %1, %12, %cst_13 {dimension_numbers = #tpu.dot_dimension_numbers<[1], [0], [0], [1], [0, 0, 1, 1], [], []>} : vector<32x32xbf16>, vector<32x32xbf16>, vector<32x32xf32> -> vector<32x32xf32>
    %c0_14 = arith.constant 0 : index
    %c0_15 = arith.constant 0 : index
    %14 = vector.load %arg7[%c0_14, %c0_15] : memref<1x32xf32, #tpu.memory_space<vmem>>, vector<1x32xf32>
    %15 = vector.broadcast %14 : vector<1x32xf32> to vector<32x32xf32>
    %16 = arith.addf %13, %15 : vector<32x32xf32>
    %17 = vector.shape_cast %6 : vector<32x32xf32> to vector<4x8x4x8xf32>
    %18 = tpu.transpose %17, [0, 2, 1, 3] : vector<4x8x4x8xf32> -> vector<4x4x8x8xf32>
    %19 = vector.shape_cast %18 : vector<4x4x8x8xf32> to vector<16x8x8xf32>
    %20 = vector.shape_cast %11 : vector<32x32xf32> to vector<4x8x4x8xf32>
    %21 = tpu.transpose %20, [0, 2, 1, 3] : vector<4x8x4x8xf32> -> vector<4x4x8x8xf32>
    %22 = vector.shape_cast %21 : vector<4x4x8x8xf32> to vector<16x8x8xf32>
    %23 = vector.shape_cast %16 : vector<32x32xf32> to vector<4x8x4x8xf32>
    %24 = tpu.transpose %23, [0, 2, 1, 3] : vector<4x8x4x8xf32> -> vector<4x4x8x8xf32>
    %25 = vector.shape_cast %24 : vector<4x4x8x8xf32> to vector<16x8x8xf32>
    "tpu.trace_start"() <{level = 10 : i32, message = "bld,bmd->blm"}> : () -> ()
    %cst_16 = arith.constant dense<0.000000e+00> : vector<16x8x8xf32>
    %26 = tpu.matmul %19, %22, %cst_16 {dimension_numbers = #tpu.dot_dimension_numbers<[2], [2], [1], [1], [0, 0, 0, 1, 1, 1], [0], [0]>} : vector<16x8x8xf32>, vector<16x8x8xf32>, vector<16x8x8xf32> -> vector<16x8x8xf32>
    "tpu.trace_stop"() : () -> ()
    %cst_17 = arith.constant dense<0xFF800000> : vector<16x8xf32>
    %27 = vector.multi_reduction <maximumf>, %26, %cst_17 [2] : vector<16x8x8xf32> to vector<16x8xf32>
    %28 = vector.shape_cast %27 : vector<16x8xf32> to vector<16x8x1xf32>
    %29 = vector.broadcast %28 : vector<16x8x1xf32> to vector<16x8x8xf32>
    %30 = arith.subf %26, %29 : vector<16x8x8xf32>
    %31 = math.exp %30 : vector<16x8x8xf32>
    %cst_18 = arith.constant dense<0.000000e+00> : vector<16x8xf32>
    %32 = vector.multi_reduction <add>, %31, %cst_18 [2] : vector<16x8x8xf32> to vector<16x8xf32>
    %33 = vector.shape_cast %32 : vector<16x8xf32> to vector<16x8x1xf32>
    %34 = tpu.reciprocal %33 : vector<16x8x1xf32> -> vector<16x8x1xf32>
    %35 = vector.broadcast %34 : vector<16x8x1xf32> to vector<16x8x8xf32>
    %36 = arith.mulf %31, %35 : vector<16x8x8xf32>
    "tpu.trace_start"() <{level = 10 : i32, message = "blm,bmd->bld"}> : () -> ()
    %cst_19 = arith.constant dense<0.000000e+00> : vector<16x8x8xf32>
    %37 = tpu.matmul %36, %25, %cst_19 {dimension_numbers = #tpu.dot_dimension_numbers<[2], [1], [1], [2], [0, 0, 0, 1, 1, 2], [0], [0]>} : vector<16x8x8xf32>, vector<16x8x8xf32>, vector<16x8x8xf32> -> vector<16x8x8xf32>
    "tpu.trace_stop"() : () -> ()
    %38 = vector.shape_cast %37 : vector<16x8x8xf32> to vector<4x4x8x8xf32>
    %39 = tpu.transpose %38, [0, 2, 1, 3] : vector<4x4x8x8xf32> -> vector<4x8x4x8xf32>
    %40 = vector.shape_cast %39 : vector<4x8x4x8xf32> to vector<32x32xf32>
    %41 = arith.truncf %40 : vector<32x32xf32> to vector<32x32xbf16>
    %c0_20 = arith.constant 0 : index
    %c0_21 = arith.constant 0 : index
    %42 = vector.load %arg8[%c0_20, %c0_21] : memref<32x32xbf16, #tpu.memory_space<vmem>>, vector<32x32xbf16>
    %cst_22 = arith.constant dense<0.000000e+00> : vector<32x32xf32>
    %43 = tpu.matmul %41, %42, %cst_22 {dimension_numbers = #tpu.dot_dimension_numbers<[1], [0], [0], [1], [0, 0, 1, 1], [], []>} : vector<32x32xbf16>, vector<32x32xbf16>, vector<32x32xf32> -> vector<32x32xf32>
    %c0_23 = arith.constant 0 : index
    %c0_24 = arith.constant 0 : index
    %44 = vector.load %arg9[%c0_23, %c0_24] : memref<1x32xf32, #tpu.memory_space<vmem>>, vector<1x32xf32>
    %45 = vector.broadcast %44 : vector<1x32xf32> to vector<32x32xf32>
    %46 = arith.addf %43, %45 : vector<32x32xf32>
    %47 = vector.shape_cast %46 : vector<32x32xf32> to vector<4x8x32xf32>
    %c0_25 = arith.constant 0 : index
    %c0_26 = arith.constant 0 : index
    %c0_27 = arith.constant 0 : index
    %48 = vector.load %arg10[%c0_25, %c0_26, %c0_27] : memref<4x8x32xf32, #tpu.memory_space<vmem>>, vector<4x8x32xf32>
    tpu.vector_store %arg10[%c0_25, %c0_26, %c0_27], %47 {strides = array<i32>} : memref<4x8x32xf32, #tpu.memory_space<vmem>>, vector<4x8x32xf32>,
    %c4_i32 = arith.constant 4 : i32
    %49 = arith.muli %arg0, %c4_i32 : i32
    %50 = tpu.iota {dimensions = array<i32: 0>} : vector<4x1x1x1xi32>
    %51 = vector.broadcast %49 : i32 to vector<4x1x1x1xi32>
    %52 = arith.addi %51, %50 : vector<4x1x1x1xi32>
    %c4_i32_28 = arith.constant 4 : i32
    %53 = vector.broadcast %c4_i32_28 : i32 to vector<4x1x1x1xi32>
    %54 = arith.cmpi slt, %52, %53 : vector<4x1x1x1xi32>
    %55 = vector.shape_cast %36 : vector<16x8x8xf32> to vector<4x4x8x8xf32>
    %cst_29 = arith.constant 0.000000e+00 : f32
    %56 = vector.shape_cast %54 : vector<4x1x1x1xi1> to vector<4x1x1x1xi1>
    %57 = vector.broadcast %56 : vector<4x1x1x1xi1> to vector<4x4x8x8xi1>
    %58 = vector.broadcast %cst_29 : f32 to vector<4x4x8x8xf32>
    %59 = arith.select %57, %55, %58 : vector<4x4x8x8xi1>, vector<4x4x8x8xf32>
    %cst_30 = arith.constant dense<0.000000e+00> : vector<8x8xf32>
    %60 = vector.multi_reduction <add>, %59, %cst_30 [0, 1] : vector<4x4x8x8xf32> to vector<8x8xf32>
    %cst_31 = arith.constant 0.000000e+00 : f32
    %61 = vector.broadcast %cst_31 : f32 to vector<8x120xf32>
    %62 = tpu.concatenate %60, %61 in 1 : vector<8x8xf32>, vector<8x120xf32> -> vector<8x128xf32>
    %c0_32 = arith.constant 0 : index
    %c0_33 = arith.constant 0 : index
    %c0_34 = arith.constant 0 : index
    %63 = vector.load %arg11[%c0_32, %c0_33, %c0_34] : memref<1x8x128xf32, #tpu.memory_space<vmem>>, vector<1x8x128xf32>
    %64 = vector.shape_cast %63 : vector<1x8x128xf32> to vector<8x128xf32>
    %65 = vector.shape_cast %62 : vector<8x128xf32> to vector<1x8x128xf32>
    tpu.vector_store %arg11[%c0_32, %c0_33, %c0_34], %65 {strides = array<i32>} : memref<1x8x128xf32, #tpu.memory_space<vmem>>, vector<1x8x128xf32>,
    return
  }
  func.func @transform_0(%arg0: i32) -> (i32, i32, i32) {
    %c0_i32 = arith.constant 0 : i32
    %c0_i32_0 = arith.constant 0 : i32
    %c0_i32_1 = arith.constant 0 : i32
    return %arg0, %c0_i32, %c0_i32_0 : i32, i32, i32
  }
  func.func @transform_1(%arg0: i32) -> (i32, i32) {
    %c0_i32 = arith.constant 0 : i32
    %c0_i32_0 = arith.constant 0 : i32
    %c0_i32_1 = arith.constant 0 : i32
    return %c0_i32, %c0_i32_0 : i32, i32
  }
  func.func @transform_2(%arg0: i32) -> (i32, i32) {
    %c0_i32 = arith.constant 0 : i32
    %c0_i32_0 = arith.constant 0 : i32
    %c0_i32_1 = arith.constant 0 : i32
    return %c0_i32, %c0_i32_0 : i32, i32
  }
  func.func @transform_3(%arg0: i32) -> (i32, i32) {
    %c0_i32 = arith.constant 0 : i32
    %c0_i32_0 = arith.constant 0 : i32
    %c0_i32_1 = arith.constant 0 : i32
    return %c0_i32, %c0_i32_0 : i32, i32
  }
  func.func @transform_4(%arg0: i32) -> (i32, i32) {
    %c0_i32 = arith.constant 0 : i32
    %c0_i32_0 = arith.constant 0 : i32
    %c0_i32_1 = arith.constant 0 : i32
    return %c0_i32, %c0_i32_0 : i32, i32
  }
  func.func @transform_5(%arg0: i32) -> (i32, i32) {
    %c0_i32 = arith.constant 0 : i32
    %c0_i32_0 = arith.constant 0 : i32
    %c0_i32_1 = arith.constant 0 : i32
    return %c0_i32, %c0_i32_0 : i32, i32
  }
  func.func @transform_6(%arg0: i32) -> (i32, i32) {
    %c0_i32 = arith.constant 0 : i32
    %c0_i32_0 = arith.constant 0 : i32
    %c0_i32_1 = arith.constant 0 : i32
    return %c0_i32, %c0_i32_0 : i32, i32
  }
  func.func @transform_7(%arg0: i32) -> (i32, i32) {
    %c0_i32 = arith.constant 0 : i32
    %c0_i32_0 = arith.constant 0 : i32
    %c0_i32_1 = arith.constant 0 : i32
    return %c0_i32, %c0_i32_0 : i32, i32
  }
  func.func @transform_8(%arg0: i32) -> (i32, i32) {
    %c0_i32 = arith.constant 0 : i32
    %c0_i32_0 = arith.constant 0 : i32
    %c0_i32_1 = arith.constant 0 : i32
    return %c0_i32, %c0_i32_0 : i32, i32
  }
  func.func @transform_9(%arg0: i32) -> (i32, i32, i32) {
    %c0_i32 = arith.constant 0 : i32
    %c0_i32_0 = arith.constant 0 : i32
    %c0_i32_1 = arith.constant 0 : i32
    return %arg0, %c0_i32, %c0_i32_0 : i32, i32, i32
  }
  func.func @transform_10(%arg0: i32) -> (i32, i32, i32) {
    %c0_i32 = arith.constant 0 : i32
    %c0_i32_0 = arith.constant 0 : i32
    %c0_i32_1 = arith.constant 0 : i32
    return %arg0, %c0_i32, %c0_i32_0 : i32, i32, i32
  }
}

</mosaic_0001>

<bundles_post_ra>
// kernel: _intra_cluster_core.1
= control target key start
LH: loop header
LB: loop body
LE: loop exit
PB: predicated region body
PF: predicated region fallthrough
CT: control target
= control target key end

     0   :  { %vm72_vm0 = vcmask 261120   ;;  %s5838_s28 = smov 120   ;;  %v5840_v23 = vmov 0.0   ;;  %vm5841_vm1 = vmmov 0   ;;  %v5842_v36 = vmov 1983009808   ;;  %s6993_s1 = inlined_call_operand.vmem [shape: bf16[32,32], index: 1, kind: input, shape index: {}]   ;;  %s6994_s0 = inlined_call_operand.vmem [shape: bf16[4,8,32], index: 0, kind: input, shape index: {}]   ;;  %s6995_s3 = inlined_call_operand.vmem [shape: bf16[32,32], index: 3, kind: input, shape index: {}]   ;;  %s6996_s5 = inlined_call_operand.vmem [shape: bf16[32,32], index: 5, kind: input, shape index: {}]   ;;  %s6997_s2 = inlined_call_operand.vmem [shape: f32[1,32], index: 2, kind: input, shape index: {}]   ;;  %s6998_s4 = inlined_call_operand.vmem [shape: f32[1,32], index: 4, kind: input, shape index: {}]   ;;  %s6999_s6 = inlined_call_operand.vmem [shape: f32[1,32], index: 6, kind: input, shape index: {}]   ;;  %s7000_s10 = inlined_call_operand.vmem [shape: f32[1,8,128], index: 10, kind: output, shape index: {1}]   ;;  %s7001_s7 = inlined_call_operand.vmem [shape: bf16[32,32], index: 7, kind: input, shape index: {}]   ;;  %s7002_s8 = inlined_call_operand.vmem [shape: f32[1,32], index: 8, kind: input, shape index: {}]   ;;  %s7003_s9 = inlined_call_operand.vmem [shape: f32[4,8,32], index: 9, kind: output, shape index: {0}]  }
   0x1   :  { %v5763_v0 = vld [vmem:[%s6993_s1] sm:$0xff]   ;;  %v5764_v1 = vld [vmem:[%s6993_s1 + $0x8] sm:$0xff]   ;;  %v315_v37 = vunpack.c.l.s4 %v5842_v36  ;;  %v317_v38 = vlaneseq  ;;  %v5843_v39 = vmov 1934713408   ;;  %vm2024_vm2 = vcmask 64512   ;;  %s5845_s13 = smov 16  }
   0x2   :  { %5531 = vmatprep.subr.bf16.mxu1 %v5763_v0  ;;  %v5765_v2 = vld [vmem:[%s6994_s0] sm:$0xff]   ;;  %v5766_v4 = vld [vmem:[%s6994_s0 + $0x8] sm:$0xff]   ;;  %v347_v40 = vunpack.c.l.s4 %v5843_v39  ;;  %s5846_s14 = smov 24   ;;  %vm5181_vm3 = vcmask 130048   ;;  %vm5186_vm4 = vcmask 195584  }
   0x3   :  { %5532 = vmatpush3.bf16.msra.mxu1 %v5763_v0  ;;  %5535 = vmatprep.mubr.msk.bf16.mxu1 %vm72_vm0, %v5765_v2  ;;  %v5767_v3 = vld [vmem:[%s6995_s3] sm:$0xff]   ;;  %v5770_v6 = vld [vmem:[%s6996_s5 + $0x8] sm:$0xff]   ;;  %v316_v41 = vunpack.c.0.s8 %v315_v37  ;;  %v318_v42 = vshrl.u32 %v317_v38, 7 }
   0x4   :  { %5533 = vmatprep.subr.bf16.mxu1 %v5764_v1  ;;  %5551 = vmatprep.mubr.msk.bf16.mxu0 %vm72_vm0, %v5765_v2  ;;  %v5769_v5 = vld [vmem:[%s6996_s5] sm:$0xff]   ;;  %v5768_v7 = vld [vmem:[%s6995_s3 + $0x8] sm:$0xff]   ;;  %s5837_s3 = smov 112   ;;  %v348_v45 = vunpack.c.0.s8 %v347_v40 }
   0x5   :  { %5547 = vmatprep.subr.bf16.mxu0 %v5769_v5  ;;  %v5349_v8 = vld [vmem:[%s6997_s2] ss:$0 sm:$0xff]  ;;  %s5839_s2 = smov 104   ;;  %v6033_v46 = vsub.s32 %v316_v41, %v318_v42 }
   0x6   :  { %5548 = vmatpush3.bf16.msra.mxu0 %v5769_v5  ;;  %v5356_v15 = vld [vmem:[%s6998_s4] ss:$0 sm:$0xff]  ;;  %v6037_v53 = vsub.s32 %v348_v45, %v318_v42 }
   0x7   :  { %5534 = vmatpush3.bf16.msra.mxu1 %v5764_v1  ;;  %5549 = vmatprep.subr.bf16.mxu0 %v5770_v6  ;;  %v5361_v28 = vld [vmem:[%s6999_s6] ss:$0 sm:$0xff] }
   0x8   :  { %5539 = vmatprep.subr.bf16.mxu1 %v5767_v3 }
   0xa   :  { %5536 = vmatmul.mubr.msk.bf16.vlgmr.msra.gmra.mrb[0].mxu1 %vm72_vm0, %v5766_v4  ;;  %5550 = vmatpush3.bf16.msra.mxu0 %v5770_v6 }
   0xb   :  { %5540 = vmatpush3.bf16.msra.mxu1 %v5767_v3  ;;  %5543 = vmatprep.mubr.msk.bf16.mxu1 %vm72_vm0, %v5765_v2 }
   0xc   :  { %5541 = vmatprep.subr.bf16.mxu1 %v5768_v7  ;;  %5565 = vmatprep.subr.mxu0 %v5840_v23 }
   0xd   :  { %5552 = vmatmul.mubr.msk.bf16.vlgmr.msra.gmra.mrb[0].mxu0 %vm72_vm0, %v5766_v4 }
   0xe   :  { %5567 = vmatprep.mubr.msk.f32.mxu0 %vm5841_vm1, %v5840_v23 }
   0xf   :  { %5542 = vmatpush3.bf16.msra.mxu1 %v5768_v7 }
  0x10   :  { %5555 = vmatprep.subr.mxu1 %v5840_v23 }
  0x12   :  { %5544 = vmatmul.mubr.msk.bf16.vlgmr.msra.gmra.mrb[4].mxu1 %vm72_vm0, %v5766_v4 }
  0x13   :  { %5557 = vmatprep.mubr.msk.f32.mxu1 %vm5841_vm1, %v5840_v23 }
  0xdd   :  { %v5537_v9 = vpop.f32.mrb[0].mxu1 }
  0xde   :  { %v113_v10 = vpop.f32.mrb[1].mxu1  ;;  %v5978_v24 = vadd.f32 %v5537_v9, %v5349_v8 }
  0xdf   :  { %v5935_v11 = vadd.f32 %v5349_v8, %v113_v10  ;;  %v5538_v12 = vpop.f32.mrb[2].mxu1 }
  0xe0   :  { %v116_v13 = vpop.f32.mrb[3].mxu1  ;;  %v5998_v26 = vadd.f32 %v5538_v12, %v5349_v8  ;;  %v5553_v27 = vpop.f32.mrb[0].mxu0 }
  0xe1   :  { %288 = vrot.lane.b32.xlu0 %v5935_v11, %s5837_s3  ;;  %276 = vrot.lane.b32.xlu1 %v5935_v11, %s5838_s28  ;;  %v5941_v14 = vadd.f32 %v5349_v8, %v116_v13  ;;  %v257_v29 = vpop.f32.mrb[1].mxu0  ;;  %v6027_v35 = vadd.f32 %v5553_v27, %v5361_v28 }
  0xe2   :  { %v6011_v30 = vadd.f32 %v5361_v28, %v257_v29  ;;  %v5554_v31 = vpop.f32.mrb[2].mxu0 }
  0xe3   :  { %v6013_v32 = vadd.f32 %v5554_v31, %v5361_v28  ;;  %v260_v33 = vpop.f32.mrb[3].mxu0 }
  0xe4   :  { %v6019_v34 = vadd.f32 %v5361_v28, %v260_v33 }
  0xe5   :  { %v5545_v16 = vpop.f32.mrb[4].mxu1  ;;  %290 = vrot.lane.b32.xlu0 %v5941_v14, %s5837_s3  ;;  %300 = vrot.lane.b32.xlu1 %v5935_v11, %s5839_s2 }
  0xe6   :  { %v185_v17 = vpop.f32.mrb[5].mxu1  ;;  %v5960_v21 = vadd.f32 %v5545_v16, %v5356_v15 }
  0xe7   :  { %v5950_v18 = vadd.f32 %v5356_v15, %v185_v17  ;;  %v5546_v19 = vpop.f32.mrb[6].mxu1 }
  0xe8   :  { %v188_v20 = vpop.f32.mrb[7].mxu1  ;;  %v5992_v25 = vadd.f32 %v5546_v19, %v5356_v15 }
  0xe9   :  { %860 = vrot.lane.b32.xlu0 %v5950_v18, %s5838_s28  ;;  %278 = vrot.lane.b32.xlu1 %v5941_v14, %s5838_s28  ;;  %v5966_v22 = vadd.f32 %v5356_v15, %v188_v20 }
  0xed   :  { %872 = vrot.lane.b32.xlu0 %v5950_v18, %s5837_s3  ;;  %884 = vrot.lane.b32.xlu1 %v5950_v18, %s5839_s2 }
  0xf1   :  { %864 = vrot.lane.b32.xlu0 %v5960_v21, %s5838_s28  ;;  %302 = vrot.lane.b32.xlu1 %v5941_v14, %s5839_s2 }
  0xf5   :  { %862 = vrot.lane.b32.xlu0 %v5966_v22, %s5838_s28  ;;  %876 = vrot.lane.b32.xlu1 %v5960_v21, %s5837_s3 }
  0xf9   :  { %886 = vrot.lane.b32.xlu0 %v5966_v22, %s5839_s2  ;;  %874 = vrot.lane.b32.xlu1 %v5966_v22, %s5837_s3 }
  0xfd   :  { %888 = vrot.lane.b32.xlu0 %v5960_v21, %s5839_s2  ;;  %280 = vrot.lane.b32.xlu1 %v5978_v24, %s5838_s28 }
 0x101   :  { %292 = vrot.lane.b32.xlu0 %v5978_v24, %s5837_s3  ;;  %304 = vrot.lane.b32.xlu1 %v5978_v24, %s5839_s2 }
 0x105   :  { %866 = vrot.lane.b32.xlu0 %v5992_v25, %s5838_s28  ;;  %878 = vrot.lane.b32.xlu1 %v5992_v25, %s5837_s3 }
 0x109   :  { %890 = vrot.lane.b32.xlu0 %v5992_v25, %s5839_s2  ;;  %282 = vrot.lane.b32.xlu1 %v5998_v26, %s5838_s28 }
 0x10d   :  { %294 = vrot.lane.b32.xlu0 %v5998_v26, %s5837_s3  ;;  %306 = vrot.lane.b32.xlu1 %v5998_v26, %s5839_s2 }
 0x111   :  { %1444 = vrot.lane.b32.xlu1 %v6011_v30, %s5838_s28  ;;  %1456 = vrot.lane.b32.xlu0 %v6011_v30, %s5837_s3 }
 0x115   :  { %1468 = vrot.lane.b32.xlu1 %v6011_v30, %s5839_s2  ;;  %1446 = vrot.lane.b32.xlu0 %v6019_v34, %s5838_s28 }
 0x119   :  { %1458 = vrot.lane.b32.xlu1 %v6019_v34, %s5837_s3 }
 0x11d   :  { %1470 = vrot.lane.b32.xlu1 %v6019_v34, %s5839_s2 }
 0x121   :  { %1448 = vrot.lane.b32.xlu1 %v6027_v35, %s5838_s28 }
 0x153   :  { %v289_v43 = vpop.permute.xlu0 %288  ;;  %v277_v44 = vpop.permute.xlu1 %276 }
 0x154   :  { %v312_v47 = vcombine.low %v5935_v11, %v289_v43  ;;  %v313_v48 = vcombine.high %v5935_v11, %v289_v43 }
 0x156   :  { %v320_v54 = vrot.slane %v312_v47, %v6033_v46  ;;  %v327_v55 = vrot.slane %v313_v48, %v6033_v46 }
 0x157   :  { %v291_v49 = vpop.permute.xlu0 %290  ;;  %v301_v50 = vpop.permute.xlu1 %300 }
 0x158   :  { %v328_v51 = vcombine.low %v277_v44, %v301_v50  ;;  %v329_v52 = vcombine.high %v277_v44, %v301_v50  ;;  %v380_v58 = vcombine.low %v5941_v14, %v291_v49  ;;  %v381_v5 = vcombine.high %v5941_v14, %v291_v49 }
 0x15a   :  { %v336_v56 = vrot.slane %v328_v51, %v6033_v46  ;;  %v343_v57 = vrot.slane %v329_v52, %v6033_v46  ;;  %v388_v6 = vrot.slane %v380_v58, %v6033_v46  ;;  %v395_v37 = vrot.slane %v381_v5, %v6033_v46 }
 0x15b   :  { %v861_v59 = vpop.permute.xlu0 %860  ;;  %v279_v60 = vpop.permute.xlu1 %278 }
 0x15c   :  { %v344_v61 = vcombine.low %v320_v54, %v336_v56  ;;  %v345_v62 = vcombine.high %v320_v54, %v336_v56  ;;  %v360_v63 = vcombine.low %v327_v55, %v343_v57  ;;  %v361_v0 = vcombine.high %v327_v55, %v343_v57 }
 0x15e   :  { %v352_v1 = vrot.slane %v344_v61, %v6037_v53  ;;  %v359_v2 = vrot.slane %v345_v62, %v6037_v53  ;;  %v368_v3 = vrot.slane %v360_v63, %v6037_v53  ;;  %v375_v4 = vrot.slane %v361_v0, %v6037_v53 }
 0x15f   :  { %v873_v7 = vpop.permute.xlu0 %872  ;;  %v885_v8 = vpop.permute.xlu1 %884 }
 0x160   :  { %v584_v9 = vcombine.low %v352_v1, %v359_v2  ;;  %v5366_v10 = vcombine.high %v352_v1, %v359_v2  ;;  %v600_v11 = vcombine.low %v368_v3, %v375_v4  ;;  %v5367_v12 = vcombine.high %v368_v3, %v375_v4 }
 0x161   :  { %v896_v13 = vcombine.low %v5950_v18, %v873_v7  ;;  %v897_v15 = vcombine.high %v5950_v18, %v873_v7  ;;  %v912_v16 = vcombine.low %v861_v59, %v885_v8  ;;  %v913_v17 = vcombine.high %v861_v59, %v885_v8 }
 0x162   :  { %v6053_v19 = vrot.slane %v584_v9, %v6033_v46  ;;  %v6056_v20 = vrot.slane %v5366_v10, %v6033_v46  ;;  %v6059_v14 = vrot.slane %v600_v11, %v6033_v46  ;;  %v6062_v27 = vrot.slane %v5367_v12, %v6033_v46 }
 0x163   :  { %v904_v28 = vrot.slane %v896_v13, %v6033_v46  ;;  %v911_v29 = vrot.slane %v897_v15, %v6033_v46  ;;  %v920_v18 = vrot.slane %v912_v16, %v6033_v46  ;;  %v927_v31 = vrot.slane %v913_v17, %v6033_v46  ;;  %v6068_v33 = vpop.permute.xlu0 %864  ;;  %v303_v36 = vpop.permute.xlu1 %302 }
 0x164   :  { %v616_v38 = vcombine.low %v6053_v19, %v6056_v20  ;;  %v617_v39 = vcombine.high %v6053_v19, %v6056_v20  ;;  %v632_v40 = vcombine.low %v6059_v14, %v6062_v27  ;;  %v633_v45 = vcombine.high %v6059_v14, %v6062_v27 }
 0x165   :  { %v928_v41 = vcombine.low %v904_v28, %v920_v18  ;;  %v929_v42 = vcombine.high %v904_v28, %v920_v18  ;;  %v944_v43 = vcombine.low %v911_v29, %v927_v31  ;;  %v945_v44 = vcombine.high %v911_v29, %v927_v31 }
 0x166   :  { %v396_v47 = vcombine.low %v279_v60, %v303_v36  ;;  %v397_v48 = vcombine.high %v279_v60, %v303_v36  ;;  %v6080_v49 = vrot.slane %v616_v38, %v6037_v53  ;;  %v6090_v60 = vrot.slane %v632_v40, %v6037_v53 }
 0x167   :  { %v936_v50 = vrot.slane %v928_v41, %v6037_v53  ;;  %v943_v51 = vrot.slane %v929_v42, %v6037_v53  ;;  %v952_v52 = vrot.slane %v944_v43, %v6037_v53  ;;  %v959_v54 = vrot.slane %v945_v44, %v6037_v53  ;;  %v863_v55 = vpop.permute.xlu0 %862  ;;  %v877_v56 = vpop.permute.xlu1 %876 }
 0x168   :  { %v404_v57 = vrot.slane %v396_v47, %v6033_v46  ;;  %v411_v58 = vrot.slane %v397_v48, %v6033_v46  ;;  %v1032_v59 = vcombine.low %v5960_v21, %v877_v56  ;;  %v1033_v28 = vcombine.high %v5960_v21, %v877_v56 }
 0x169   :  { %v1168_v61 = vcombine.low %v936_v50, %v943_v51  ;;  %v5374_v62 = vcombine.high %v936_v50, %v943_v51  ;;  %v1184_v63 = vcombine.low %v952_v52, %v959_v54  ;;  %v5375_v0 = vcombine.high %v952_v52, %v959_v54 }
 0x16a   :  { %v412_v1 = vcombine.low %v388_v6, %v404_v57  ;;  %v413_v2 = vcombine.high %v388_v6, %v404_v57  ;;  %v428_v3 = vcombine.low %v395_v37, %v411_v58  ;;  %v429_v4 = vcombine.high %v395_v37, %v411_v58 }
 0x16b   :  { %v1175_v5 = vrot.slane %v1168_v61, %v6033_v46  ;;  %v1183_v7 = vrot.slane %v5374_v62, %v6033_v46  ;;  %v1191_v8 = vrot.slane %v1184_v63, %v6033_v46  ;;  %v1199_v9 = vrot.slane %v5375_v0, %v6033_v46  ;;  %v887_v10 = vpop.permute.xlu0 %886  ;;  %v875_v37 = vpop.permute.xlu1 %874 }
 0x16c   :  { %v420_v11 = vrot.slane %v412_v1, %v6037_v53  ;;  %v427_v12 = vrot.slane %v413_v2, %v6037_v53  ;;  %v436_v13 = vrot.slane %v428_v3, %v6037_v53  ;;  %v443_v15 = vrot.slane %v429_v4, %v6037_v53 }
 0x16d   :  { %v1200_v6 = vcombine.low %v1175_v5, %v1183_v7  ;;  %v1201_v16 = vcombine.high %v1175_v5, %v1183_v7  ;;  %v1216_v17 = vcombine.low %v1191_v8, %v1199_v9  ;;  %v1217_v38 = vcombine.high %v1191_v8, %v1199_v9 }
 0x16e   :  { %v652_v29 = vcombine.low %v420_v11, %v427_v12  ;;  %v5368_v18 = vcombine.high %v420_v11, %v427_v12  ;;  %v668_v31 = vcombine.low %v436_v13, %v443_v15  ;;  %v5369_v36 = vcombine.high %v436_v13, %v443_v15 }
 0x16f   :  { %v1040_v40 = vrot.slane %v1032_v59, %v6033_v46  ;;  %v980_v41 = vcombine.low %v863_v55, %v887_v10  ;;  %v981_v42 = vcombine.high %v863_v55, %v887_v10  ;;  %v889_v48 = vpop.permute.xlu0 %888  ;;  %v964_v52 = vcombine.low %v5966_v22, %v875_v37 }
 0x170   :  { %v6103_v43 = vrot.slane %v652_v29, %v6033_v46  ;;  %v6106_v44 = vrot.slane %v5368_v18, %v6033_v46  ;;  %v6109_v47 = vrot.slane %v668_v31, %v6033_v46  ;;  %v6112_v21 = vrot.slane %v5369_v36, %v6033_v46 }
 0x171   :  { %v988_v50 = vrot.slane %v980_v41, %v6033_v46  ;;  %v995_v51 = vrot.slane %v981_v42, %v6033_v46  ;;  %v965_v54 = vcombine.high %v5966_v22, %v875_v37  ;;  %v1047_v58 = vrot.slane %v1033_v28, %v6033_v46  ;;  %v6129_v22 = vpop.permute.xlu1 %280 }
 0x172   :  { %v684_v55 = vcombine.low %v6103_v43, %v6106_v44  ;;  %v685_v56 = vcombine.high %v6103_v43, %v6106_v44  ;;  %v700_v57 = vcombine.low %v6109_v47, %v6112_v21  ;;  %v972_v59 = vrot.slane %v964_v52, %v6033_v46 }
 0x173   :  { %v979_v61 = vrot.slane %v965_v54, %v6033_v46  ;;  %v1048_v62 = vcombine.low %v6068_v33, %v889_v48  ;;  %v1049_v63 = vcombine.high %v6068_v33, %v889_v48  ;;  %v6132_v0 = vrot.slane %v1200_v6, %v6037_v53  ;;  %v293_v18 = vpop.permute.xlu0 %292 }
 0x174   :  { %v6135_v1 = vrot.slane %v1216_v17, %v6037_v53  ;;  %v6138_v2 = vrot.slane %v1201_v16, %v6037_v53  ;;  %v6141_v3 = vrot.slane %v1217_v38, %v6037_v53  ;;  %v996_v4 = vcombine.low %v972_v59, %v988_v50 }
 0x175   :  { %v997_v5 = vcombine.high %v972_v59, %v988_v50  ;;  %v1012_v7 = vcombine.low %v979_v61, %v995_v51  ;;  %v1013_v8 = vcombine.high %v979_v61, %v995_v51  ;;  %v1056_v33 = vrot.slane %v1048_v62, %v6033_v46 }
 0x176   :  { %v1063_v9 = vrot.slane %v1049_v63, %v6033_v46  ;;  %v1232_v10 = vcombine.low %v6132_v0, %v6135_v1  ;;  %v1234_v11 = vcombine.low %v6138_v2, %v6141_v3  ;;  %v1004_v12 = vrot.slane %v996_v4, %v6037_v53 }
 0x177   :  { %v1011_v13 = vrot.slane %v997_v5, %v6037_v53  ;;  %v1020_v15 = vrot.slane %v1012_v7, %v6037_v53  ;;  %v1027_v6 = vrot.slane %v1013_v8, %v6037_v53  ;;  %v1064_v16 = vcombine.low %v1040_v40, %v1056_v33 }
 0x178   :  { %v1065_v17 = vcombine.high %v1040_v40, %v1056_v33  ;;  %v1080_v28 = vcombine.low %v1047_v58, %v1063_v9  ;;  %v1081_v29 = vcombine.high %v1047_v58, %v1063_v9  ;;  %5556 = vmatpush3.xpose.msk.msra.mxu1 %vm2024_vm2, %v1232_v10  ;;  %5566 = vmatpush3.xpose.msk.msra.mxu0 %vm2024_vm2, %v1234_v11  ;;  %v305_v40 = vpop.permute.xlu1 %304 }
 0x179   :  { %v1236_v31 = vcombine.low %v1004_v12, %v1011_v13  ;;  %v5376_v36 = vcombine.high %v1004_v12, %v1011_v13  ;;  %v1252_v37 = vcombine.low %v1020_v15, %v1027_v6  ;;  %v5377_v38 = vcombine.high %v1020_v15, %v1027_v6  ;;  %5560 = vmatprep.subr.mxu1 %v5840_v23  ;;  %v867_v12 = vpop.permute.xlu0 %866 }
 0x17a   :  { %v1072_v41 = vrot.slane %v1064_v16, %v6037_v53  ;;  %v1079_v42 = vrot.slane %v1065_v17, %v6037_v53  ;;  %v1088_v48 = vrot.slane %v1080_v28, %v6037_v53  ;;  %v1095_v50 = vrot.slane %v1081_v29, %v6037_v53  ;;  %5575 = vmatprep.subr.mxu0 %v5840_v23 }
 0x17b   :  { %v6161_v51 = vrot.slane %v1236_v31, %v6033_v46  ;;  %v6164_v52 = vrot.slane %v5376_v36, %v6033_v46  ;;  %v6167_v54 = vrot.slane %v1252_v37, %v6033_v46  ;;  %v6170_v58 = vrot.slane %v5377_v38, %v6033_v46 }
 0x17c   :  { %v1304_v59 = vcombine.low %v1072_v41, %v1079_v42  ;;  %v5378_v61 = vcombine.high %v1072_v41, %v1079_v42  ;;  %v1320_v62 = vcombine.low %v1088_v48, %v1095_v50  ;;  %v5379_v63 = vcombine.high %v1088_v48, %v1095_v50  ;;  %v879_v36 = vpop.permute.xlu1 %878 }
 0x17d   :  { %v701_v4 = vcombine.high %v6109_v47, %v6112_v21  ;;  %v1268_v5 = vcombine.low %v6161_v51, %v6164_v52  ;;  %v1269_v7 = vcombine.high %v6161_v51, %v6164_v52  ;;  %v1284_v8 = vcombine.low %v6167_v54, %v6170_v58 }
 0x17e   :  { %v6182_v33 = vrot.slane %v1304_v59, %v6033_v46  ;;  %v6185_v9 = vrot.slane %v5378_v61, %v6033_v46  ;;  %v6188_v10 = vrot.slane %v1320_v62, %v6033_v46  ;;  %v6191_v11 = vrot.slane %v5379_v63, %v6033_v46 }
 0x17f   :  { %v448_v13 = vcombine.low %v5978_v24, %v293_v18  ;;  %v449_v15 = vcombine.high %v5978_v24, %v293_v18  ;;  %v464_v6 = vcombine.low %v6129_v22, %v305_v40  ;;  %v465_v16 = vcombine.high %v6129_v22, %v305_v40 }
 0x180   :  { %v1285_v17 = vcombine.high %v6167_v54, %v6170_v58  ;;  %v1336_v28 = vcombine.low %v6182_v33, %v6185_v9  ;;  %v1337_v29 = vcombine.high %v6182_v33, %v6185_v9  ;;  %v1352_v31 = vcombine.low %v6188_v10, %v6191_v11 }
 0x181   :  { %v456_v37 = vrot.slane %v448_v13, %v6033_v46  ;;  %v463_v24 = vrot.slane %v449_v15, %v6033_v46  ;;  %v472_v18 = vrot.slane %v464_v6, %v6033_v46  ;;  %v479_v22 = vrot.slane %v465_v16, %v6033_v46 }
 0x182   :  { %v648_v38 = vcombine.low %v6080_v49, %v6090_v60  ;;  %v631_v41 = vrot.slane %v617_v39, %v6037_v53  ;;  %v647_v42 = vrot.slane %v633_v45, %v6037_v53  ;;  %v1233_v48 = vcombine.high %v6132_v0, %v6135_v1  ;;  %v891_v39 = vpop.permute.xlu0 %890 }
 0x183   :  { %v480_v50 = vcombine.low %v456_v37, %v472_v18  ;;  %v481_v40 = vcombine.high %v456_v37, %v472_v18  ;;  %v496_v59 = vcombine.low %v463_v24, %v479_v22  ;;  %v497_v61 = vcombine.high %v463_v24, %v479_v22 }
 0x184   :  { %5558 = vmatmul.mubr.msk.f32.vlgmr.msra.gmra.mrb[8].mxu1 %vm2024_vm2, %v648_v38  ;;  %v650_v62 = vcombine.low %v631_v41, %v647_v42  ;;  %v1100_v63 = vcombine.low %v5992_v25, %v879_v36  ;;  %v1101_v19 = vcombine.high %v5992_v25, %v879_v36  ;;  %v649_v20 = vcombine.high %v6080_v49, %v6090_v60  ;;  %v283_v60 = vpop.permute.xlu1 %282 }
 0x185   :  { %v488_v14 = vrot.slane %v480_v50, %v6037_v53  ;;  %v495_v27 = vrot.slane %v481_v40, %v6037_v53  ;;  %v504_v45 = vrot.slane %v496_v59, %v6037_v53  ;;  %v511_v0 = vrot.slane %v497_v61, %v6037_v53  ;;  %5561 = vmatpush3.xpose.msk.msra.mxu1 %vm2024_vm2, %v1233_v48 }
 0x186   :  { %5568 = vmatmul.mubr.msk.f32.vlgmr.msra.gmra.mrb[4].mxu0 %vm2024_vm2, %v650_v62  ;;  %v1108_v1 = vrot.slane %v1100_v63, %v6033_v46  ;;  %v1115_v25 = vrot.slane %v1101_v19, %v6033_v46  ;;  %5562 = vmatprep.mubr.msk.f32.mxu1 %vm5841_vm1, %v5840_v23  ;;  %v1235_v49 = vcombine.high %v6138_v2, %v6141_v3 }
 0x187   :  { %v720_v13 = vcombine.low %v488_v14, %v495_v27  ;;  %v5370_v15 = vcombine.high %v488_v14, %v495_v27  ;;  %v736_v6 = vcombine.low %v504_v45, %v511_v0  ;;  %v5371_v16 = vcombine.high %v504_v45, %v511_v0  ;;  %5570 = vmatprep.subr.mxu1 %v5840_v23 }
 0x188   :  { %5563 = vmatmul.mubr.msk.f32.vlgmr.msra.gmra.mrb[10].mxu1 %vm2024_vm2, %v649_v20  ;;  %v1116_v36 = vcombine.low %v867_v12, %v891_v39  ;;  %v1117_v37 = vcombine.high %v867_v12, %v891_v39  ;;  %v651_v24 = vcombine.high %v631_v41, %v647_v42  ;;  %v1276_v18 = vrot.slane %v1268_v5, %v6037_v53  ;;  %v295_v41 = vpop.permute.xlu0 %294  ;;  %v307_v19 = vpop.permute.xlu1 %306 }
 0x189   :  { %v6242_v22 = vrot.slane %v720_v13, %v6033_v46  ;;  %v6245_v38 = vrot.slane %v5370_v15, %v6033_v46  ;;  %v6248_v2 = vrot.slane %v736_v6, %v6033_v46  ;;  %v6251_v3 = vrot.slane %v5371_v16, %v6033_v46  ;;  %5571 = vmatpush3.xpose.msk.msra.mxu1 %vm2024_vm2, %v1235_v49 }
 0x18a   :  { %v1124_v48 = vrot.slane %v1116_v36, %v6033_v46  ;;  %v1131_v12 = vrot.slane %v1117_v37, %v6033_v46  ;;  %5572 = vmatprep.mubr.msk.f32.mxu1 %vm5841_vm1, %v5840_v23  ;;  %5580 = vmatprep.subr.mxu1 %v5840_v23  ;;  %v1292_v5 = vrot.slane %v1284_v8, %v6037_v53 }
 0x18b   :  { %v1353_v42 = vcombine.high %v6188_v10, %v6191_v11  ;;  %v752_v50 = vcombine.low %v6242_v22, %v6245_v38  ;;  %v753_v40 = vcombine.high %v6242_v22, %v6245_v38  ;;  %v768_v59 = vcombine.low %v6248_v2, %v6251_v3  ;;  %5577 = vmatprep.mubr.msk.f32.mxu0 %vm5841_vm1, %v5840_v23 }
 0x18c   :  { %v1132_v61 = vcombine.low %v1108_v1, %v1124_v48  ;;  %v1133_v62 = vcombine.high %v1108_v1, %v1124_v48  ;;  %v1148_v63 = vcombine.low %v1115_v25, %v1131_v12  ;;  %v1149_v8 = vcombine.high %v1115_v25, %v1131_v12  ;;  %5573 = vmatmul.mubr.msk.f32.vlgmr.msra.gmra.mrb[12].mxu1 %vm2024_vm2, %v651_v24 }
 0x18d   :  { %v1300_v20 = vcombine.low %v1276_v18, %v1292_v5  ;;  %v1301_v39 = vcombine.high %v1276_v18, %v1292_v5  ;;  %v516_v14 = vcombine.low %v5998_v26, %v295_v41  ;;  %v517_v27 = vcombine.high %v5998_v26, %v295_v41  ;;  %5582 = vmatprep.mubr.msk.f32.mxu1 %vm5841_vm1, %v5840_v23 }
 0x18e   :  { %v1140_v45 = vrot.slane %v1132_v61, %v6037_v53  ;;  %v1147_v0 = vrot.slane %v1133_v62, %v6037_v53  ;;  %v1156_v1 = vrot.slane %v1148_v63, %v6037_v53  ;;  %v1163_v25 = vrot.slane %v1149_v8, %v6037_v53 }
 0x18f   :  { %5576 = vmatpush3.xpose.msk.msra.mxu0 %vm2024_vm2, %v1300_v20  ;;  %5581 = vmatpush3.xpose.msk.msra.mxu1 %vm2024_vm2, %v1301_v39  ;;  %v524_v49 = vrot.slane %v516_v14, %v6033_v46  ;;  %v531_v13 = vrot.slane %v517_v27, %v6033_v46  ;;  %v532_v26 = vcombine.low %v283_v60, %v307_v19 }
 0x190   :  { %v1372_v15 = vcombine.low %v1140_v45, %v1147_v0  ;;  %v5380_v6 = vcombine.high %v1140_v45, %v1147_v0  ;;  %v1388_v16 = vcombine.low %v1156_v1, %v1163_v25  ;;  %v5381_v36 = vcombine.high %v1156_v1, %v1163_v25  ;;  %5585 = vmatprep.subr.mxu0 %v5840_v23 }
 0x191   :  { %v533_v37 = vcombine.high %v283_v60, %v307_v19  ;;  %v540_v24 = vrot.slane %v532_v26, %v6033_v46  ;;  %v692_v18 = vrot.slane %v684_v55, %v6037_v53  ;;  %v708_v48 = vrot.slane %v700_v57, %v6037_v53  ;;  %5590 = vmatprep.subr.mxu1 %v5840_v23 }
 0x192   :  { %v6298_v12 = vrot.slane %v1372_v15, %v6033_v46  ;;  %v6301_v5 = vrot.slane %v5380_v6, %v6033_v46  ;;  %v6304_v60 = vrot.slane %v1388_v16, %v6033_v46  ;;  %v6307_v41 = vrot.slane %v5381_v36, %v6033_v46 }
 0x193   :  { %v547_v55 = vrot.slane %v533_v37, %v6033_v46  ;;  %v548_v61 = vcombine.low %v524_v49, %v540_v24  ;;  %v549_v62 = vcombine.high %v524_v49, %v540_v24  ;;  %v716_v63 = vcombine.low %v692_v18, %v708_v48 }
 0x194   :  { %v769_v57 = vcombine.high %v6248_v2, %v6251_v3  ;;  %v1404_v8 = vcombine.low %v6298_v12, %v6301_v5  ;;  %v1405_v19 = vcombine.high %v6298_v12, %v6301_v5  ;;  %v1420_v20 = vcombine.low %v6304_v60, %v6307_v41 }
 0x195   :  { %v556_v39 = vrot.slane %v548_v61, %v6037_v53  ;;  %v563_v14 = vrot.slane %v549_v62, %v6037_v53  ;;  %v564_v27 = vcombine.low %v531_v13, %v547_v55  ;;  %v565_v45 = vcombine.high %v531_v13, %v547_v55  ;;  %5578 = vmatmul.mubr.msk.f32.vlgmr.msra.gmra.mrb[6].mxu0 %vm2024_vm2, %v716_v63 }
 0x196   :  { %v717_v0 = vcombine.high %v692_v18, %v708_v48  ;;  %v1283_v1 = vrot.slane %v1269_v7, %v6037_v53  ;;  %v1299_v25 = vrot.slane %v1285_v17, %v6037_v53  ;;  %5587 = vmatprep.mubr.msk.f32.mxu0 %vm5841_vm1, %v5840_v23  ;;  %v699_v49 = vrot.slane %v685_v56, %v6037_v53 }
 0x197   :  { %v572_v13 = vrot.slane %v564_v27, %v6037_v53  ;;  %v579_v26 = vrot.slane %v565_v45, %v6037_v53  ;;  %v788_v15 = vcombine.low %v556_v39, %v563_v14  ;;  %v5372_v51 = vcombine.high %v556_v39, %v563_v14 }
 0x198   :  { %5583 = vmatmul.mubr.msk.f32.vlgmr.msra.gmra.mrb[14].mxu1 %vm2024_vm2, %v717_v0  ;;  %v1302_v52 = vcombine.low %v1283_v1, %v1299_v25  ;;  %v1303_v7 = vcombine.high %v1283_v1, %v1299_v25  ;;  %v715_v54 = vrot.slane %v701_v4, %v6037_v53  ;;  %v1344_v43 = vrot.slane %v1336_v28, %v6037_v53 }
 0x199   :  { %v6347_v44 = vrot.slane %v788_v15, %v6033_v46  ;;  %v6350_v56 = vrot.slane %v5372_v51, %v6033_v46  ;;  %v804_v58 = vcombine.low %v572_v13, %v579_v26  ;;  %v5373_v17 = vcombine.high %v572_v13, %v579_v26  ;;  %5592 = vmatprep.mubr.msk.f32.mxu1 %vm5841_vm1, %v5840_v23 }
 0x19a   :  { %v1421_v47 = vcombine.high %v6304_v60, %v6307_v41  ;;  %5586 = vmatpush3.xpose.msk.msra.mxu0 %vm2024_vm2, %v1302_v52  ;;  %5591 = vmatpush3.xpose.msk.msra.mxu1 %vm2024_vm2, %v1303_v7  ;;  %v718_v21 = vcombine.low %v699_v49, %v715_v54  ;;  %v1360_v4 = vrot.slane %v1352_v31, %v6037_v53 }
 0x19b   :  { %v811_v28 = vrot.slane %v804_v58, %v6033_v46  ;;  %v819_v6 = vrot.slane %v5373_v17, %v6033_v46  ;;  %v820_v16 = vcombine.low %v6347_v44, %v6350_v56  ;;  %v719_v36 = vcombine.high %v699_v49, %v715_v54  ;;  %5595 = vmatprep.subr.mxu0 %v5840_v23 }
 0x19c   :  { %5600 = vmatprep.subr.mxu1 %v5840_v23  ;;  %v1368_v37 = vcombine.low %v1344_v43, %v1360_v4  ;;  %v1369_v24 = vcombine.high %v1344_v43, %v1360_v4  ;;  %v760_v18 = vrot.slane %v752_v50, %v6037_v53  ;;  %v776_v31 = vrot.slane %v768_v59, %v6037_v53 }
 0x19d   :  { %v821_v48 = vcombine.high %v6347_v44, %v6350_v56  ;;  %v836_v60 = vcombine.low %v811_v28, %v819_v6  ;;  %5588 = vmatmul.mubr.msk.f32.vlgmr.msra.gmra.mrb[8].mxu0 %vm2024_vm2, %v718_v21  ;;  %5593 = vmatmul.mubr.msk.f32.vlgmr.msra.gmra.mrb[16].mxu1 %vm2024_vm2, %v719_v36  ;;  %v1351_v41 = vrot.slane %v1337_v29, %v6037_v53 }
 0x19e   :  { %5596 = vmatpush3.xpose.msk.msra.mxu0 %vm2024_vm2, %v1368_v37  ;;  %5601 = vmatpush3.xpose.msk.msra.mxu1 %vm2024_vm2, %v1369_v24  ;;  %v784_v50 = vcombine.low %v760_v18, %v776_v31  ;;  %v785_v2 = vcombine.high %v760_v18, %v776_v31  ;;  %v1367_v3 = vrot.slane %v1353_v42, %v6037_v53 }
 0x19f   :  { %5597 = vmatprep.mubr.msk.f32.mxu0 %vm5841_vm1, %v5840_v23  ;;  %5602 = vmatprep.mubr.msk.f32.mxu1 %vm5841_vm1, %v5840_v23  ;;  %v767_v33 = vrot.slane %v753_v40, %v6037_v53  ;;  %v783_v9 = vrot.slane %v769_v57, %v6037_v53  ;;  %v1412_v29 = vrot.slane %v1404_v8, %v6037_v53  ;;  %v1445_v8 = vpop.permute.xlu1 %1444 }
 0x1a0   :  { %5605 = vmatprep.subr.mxu0 %v5840_v23  ;;  %5610 = vmatprep.subr.mxu1 %v5840_v23  ;;  %v1370_v10 = vcombine.low %v1351_v41, %v1367_v3  ;;  %v1371_v11 = vcombine.high %v1351_v41, %v1367_v3  ;;  %v1428_v42 = vrot.slane %v1420_v20, %v6037_v53  ;;  %v1457_v20 = vpop.permute.xlu0 %1456 }
 0x1a1   :  { %v837_v59 = vcombine.high %v811_v28, %v819_v6  ;;  %5598 = vmatmul.mubr.msk.f32.vlgmr.msra.gmra.mrb[10].mxu0 %vm2024_vm2, %v784_v50  ;;  %5603 = vmatmul.mubr.msk.f32.vlgmr.msra.gmra.mrb[18].mxu1 %vm2024_vm2, %v785_v2  ;;  %v786_v55 = vcombine.low %v767_v33, %v783_v9  ;;  %v828_v22 = vrot.slane %v820_v16, %v6037_v53 }
 0x1a2   :  { %5606 = vmatpush3.xpose.msk.msra.mxu0 %vm2024_vm2, %v1370_v10  ;;  %5611 = vmatpush3.xpose.msk.msra.mxu1 %vm2024_vm2, %v1371_v11  ;;  %v1436_v38 = vcombine.low %v1412_v29, %v1428_v42  ;;  %v1437_v40 = vcombine.high %v1412_v29, %v1428_v42  ;;  %v844_v61 = vrot.slane %v836_v60, %v6037_v53 }
 0x1a3   :  { %5607 = vmatprep.mubr.msk.f32.mxu0 %vm5841_vm1, %v5840_v23  ;;  %5612 = vmatprep.mubr.msk.f32.mxu1 %vm5841_vm1, %v5840_v23  ;;  %v787_v62 = vcombine.high %v767_v33, %v783_v9  ;;  %v1419_v63 = vrot.slane %v1405_v19, %v6037_v53  ;;  %v1435_v57 = vrot.slane %v1421_v47, %v6037_v53  ;;  %v1469_v1 = vpop.permute.xlu1 %1468 }
 0x1a4   :  { %5615 = vmatprep.subr.mxu0 %v5840_v23  ;;  %5620 = vmatprep.subr.mxu1 %v5840_v23  ;;  %v852_v39 = vcombine.low %v828_v22, %v844_v61  ;;  %v853_v14 = vcombine.high %v828_v22, %v844_v61  ;;  %v1480_v27 = vcombine.low %v6011_v30, %v1457_v20 }
 0x1a5   :  { %5608 = vmatmul.mubr.msk.f32.vlgmr.msra.gmra.mrb[12].mxu0 %vm2024_vm2, %v786_v55  ;;  %5613 = vmatmul.mubr.msk.f32.vlgmr.msra.gmra.mrb[20].mxu1 %vm2024_vm2, %v787_v62  ;;  %v835_v12 = vrot.slane %v821_v48, %v6037_v53  ;;  %v851_v5 = vrot.slane %v837_v59, %v6037_v53  ;;  %v1481_v19 = vcombine.high %v6011_v30, %v1457_v20 }
 0x1a6   :  { %5616 = vmatpush3.xpose.msk.msra.mxu0 %vm2024_vm2, %v1436_v38  ;;  %5621 = vmatpush3.xpose.msk.msra.mxu1 %vm2024_vm2, %v1437_v40  ;;  %v1438_v45 = vcombine.low %v1419_v63, %v1435_v57  ;;  %v1439_v0 = vcombine.high %v1419_v63, %v1435_v57  ;;  %v1488_v25 = vrot.slane %v1480_v27, %v6033_v46 }
 0x1a7   :  { %5617 = vmatprep.mubr.msk.f32.mxu0 %vm5841_vm1, %v5840_v23  ;;  %5622 = vmatprep.mubr.msk.f32.mxu1 %vm5841_vm1, %v5840_v23  ;;  %v1496_v49 = vcombine.low %v1445_v8, %v1469_v1  ;;  %v1497_v13 = vcombine.high %v1445_v8, %v1469_v1  ;;  %v1495_v26 = vrot.slane %v1481_v19, %v6033_v46 }
 0x1a8   :  { %5625 = vmatprep.subr.mxu0 %v5840_v23  ;;  %5630 = vmatprep.subr.mxu1 %v5840_v23  ;;  %v854_v51 = vcombine.low %v835_v12, %v851_v5  ;;  %v855_v52 = vcombine.high %v835_v12, %v851_v5 }
 0x1a9   :  { %5618 = vmatmul.mubr.msk.f32.vlgmr.msra.gmra.mrb[14].mxu0 %vm2024_vm2, %v852_v39  ;;  %5623 = vmatmul.mubr.msk.f32.vlgmr.msra.gmra.mrb[22].mxu1 %vm2024_vm2, %v853_v14  ;;  %v1504_v30 = vrot.slane %v1496_v49, %v6033_v46  ;;  %v1511_v15 = vrot.slane %v1497_v13, %v6033_v46 }
 0x1aa   :  { %5626 = vmatpush3.xpose.msk.msra.mxu0 %vm2024_vm2, %v1438_v45  ;;  %5631 = vmatpush3.xpose.msk.msra.mxu1 %vm2024_vm2, %v1439_v0 }
 0x1ab   :  { %5627 = vmatprep.mubr.msk.f32.mxu0 %vm5841_vm1, %v5840_v23  ;;  %5632 = vmatprep.mubr.msk.f32.mxu1 %vm5841_vm1, %v5840_v23  ;;  %v1512_v7 = vcombine.low %v1488_v25, %v1504_v30  ;;  %v1513_v54 = vcombine.high %v1488_v25, %v1504_v30  ;;  %v1528_v43 = vcombine.low %v1495_v26, %v1511_v15 }
 0x1ac   :  { %v1529_v44 = vcombine.high %v1495_v26, %v1511_v15  ;;  %5635 = vmatprep.subr.mxu0 %v5840_v23  ;;  %5640 = vmatprep.subr.mxu1 %v5840_v23 }
 0x1ad   :  { %5628 = vmatmul.mubr.msk.f32.vlgmr.msra.gmra.mrb[16].mxu0 %vm2024_vm2, %v854_v51  ;;  %5633 = vmatmul.mubr.msk.f32.vlgmr.msra.gmra.mrb[24].mxu1 %vm2024_vm2, %v855_v52  ;;  %v1520_v56 = vrot.slane %v1512_v7, %v6037_v53  ;;  %v1527_v58 = vrot.slane %v1513_v54, %v6037_v53  ;;  %v1536_v17 = vrot.slane %v1528_v43, %v6037_v53 }
 0x1ae   :  { %v1543_v47 = vrot.slane %v1529_v44, %v6037_v53  ;;  %5637 = vmatprep.mubr.msk.f32.mxu0 %vm5841_vm1, %v5840_v23  ;;  %5642 = vmatprep.mubr.msk.f32.mxu1 %vm5841_vm1, %v5840_v23 }
 0x1af   :  { %v1752_v21 = vcombine.low %v1520_v56, %v1527_v58  ;;  %v5382_v4 = vcombine.high %v1520_v56, %v1527_v58 }
 0x1b0   :  { %v1768_v28 = vcombine.low %v1536_v17, %v1543_v47  ;;  %v5383_v6 = vcombine.high %v1536_v17, %v1543_v47 }
 0x1b1   :  { %v1759_v16 = vrot.slane %v1752_v21, %v6033_v46  ;;  %v1767_v36 = vrot.slane %v5382_v4, %v6033_v46 }
 0x1b2   :  { %v1775_v37 = vrot.slane %v1768_v28, %v6033_v46  ;;  %v1783_v24 = vrot.slane %v5383_v6, %v6033_v46 }
 0x1b3   :  { %v1784_v18 = vcombine.low %v1759_v16, %v1767_v36  ;;  %v1785_v2 = vcombine.high %v1759_v16, %v1767_v36 }
 0x1b4   :  { %v1800_v31 = vcombine.low %v1775_v37, %v1783_v24  ;;  %v1801_v3 = vcombine.high %v1775_v37, %v1783_v24 }
 0x1b5   :  { %v1792_v48 = vrot.slane %v1784_v18, %v6037_v53  ;;  %v6467_v33 = vrot.slane %v1785_v2, %v6037_v53 }
 0x1b6   :  { %v1808_v60 = vrot.slane %v1800_v31, %v6037_v53  ;;  %v6470_v9 = vrot.slane %v1801_v3, %v6037_v53 }
 0x1b8   :  { %v1816_v41 = vcombine.low %v1792_v48, %v1808_v60  ;;  %v1817_v50 = vcombine.high %v1792_v48, %v1808_v60  ;;  %v1818_v29 = vcombine.low %v6467_v33, %v6470_v9  ;;  %v1819_v10 = vcombine.high %v6467_v33, %v6470_v9  ;;  %v6544_v48 = vpop.permute.xlu1 %1458  ;;  %v6546_v60 = vpop.permute.xlu0 %1446 }
 0x1ba   :  { %5636 = vmatpush3.msra.mxu0 %v1816_v41  ;;  %5641 = vmatpush3.msra.mxu1 %v1817_v50 }
 0x1bb   :  { %5645 = vmatprep.subr.mxu0 %v5840_v23  ;;  %5650 = vmatprep.subr.mxu1 %v5840_v23 }
 0x1bc   :  { %v6548_v41 = vpop.permute.xlu1 %1470 }
 0x1c0   :  { %v6550_v50 = vpop.permute.xlu1 %1448 }
 0x257   :  { %v6476_v11 = vpop.f32.mrb[8].mxu1 }
 0x258   :  { %v5559_v42 = vpop.f32.mrb[9].mxu1  ;;  %v3241_v59 = vsel %vm2024_vm2, %v6476_v11, -inf }
 0x259   :  { %v6480_v55 = vpop.f32.mrb[4].mxu0  ;;  %3242 = vmax.xlane.f32.xlu0 %v3241_v59 }
 0x25a   :  { %v5569_v22 = vpop.f32.mrb[5].mxu0  ;;  %v3247_v61 = vsel %vm2024_vm2, %v6480_v55, -inf }
 0x25b   :  { %v6482_v38 = vpop.f32.mrb[10].mxu1 }
 0x25c   :  { %v5564_v40 = vpop.f32.mrb[11].mxu1  ;;  %v3244_v62 = vsel %vm2024_vm2, %v6482_v38, -inf }
 0x25d   :  { %3248 = vmax.xlane.f32.xlu0 %v3247_v61  ;;  %3245 = vmax.xlane.f32.xlu1 %v3244_v62 }
 0x25f   :  { %v6488_v63 = vpop.f32.mrb[12].mxu1 }
 0x260   :  { %v5574_v57 = vpop.f32.mrb[13].mxu1  ;;  %v3250_v8 = vsel %vm2024_vm2, %v6488_v63, -inf }
 0x261   :  { %3251 = vmax.xlane.f32.xlu0 %v3250_v8 }
 0x268   :  { %v6492_v20 = vpop.f32.mrb[6].mxu0 }
 0x269   :  { %v5579_v39 = vpop.f32.mrb[7].mxu0  ;;  %v3253_v14 = vsel %vm2024_vm2, %v6492_v20, -inf }
 0x26a   :  { %3254 = vmax.xlane.f32.xlu1 %v3253_v14 }
 0x26b   :  { %v6496_v27 = vpop.f32.mrb[14].mxu1 }
 0x26c   :  { %v5584_v12 = vpop.f32.mrb[15].mxu1  ;;  %v3256_v5 = vsel %vm2024_vm2, %v6496_v27, -inf }
 0x26d   :  { %3257 = vmax.xlane.f32.xlu0 %v3256_v5 }
 0x270   :  { %v6500_v19 = vpop.f32.mrb[8].mxu0  ;;  %v6502_v45 = vpop.f32.mrb[16].mxu1 }
 0x271   :  { %v5589_v0 = vpop.f32.mrb[9].mxu0  ;;  %v5594_v1 = vpop.f32.mrb[17].mxu1  ;;  %v3262_v25 = vsel %vm2024_vm2, %v6502_v45, -inf  ;;  %v3259_v49 = vsel %vm2024_vm2, %v6500_v19, -inf }
 0x272   :  { %3263 = vmax.xlane.f32.xlu0 %v3262_v25  ;;  %3260 = vmax.xlane.f32.xlu1 %v3259_v49 }
 0x274   :  { %v6508_v13 = vpop.f32.mrb[10].mxu0  ;;  %v6510_v26 = vpop.f32.mrb[18].mxu1 }
 0x275   :  { %v5599_v30 = vpop.f32.mrb[11].mxu0  ;;  %v5604_v15 = vpop.f32.mrb[19].mxu1  ;;  %v3268_v51 = vsel %vm2024_vm2, %v6510_v26, -inf  ;;  %v3265_v52 = vsel %vm2024_vm2, %v6508_v13, -inf }
 0x276   :  { %3269 = vmax.xlane.f32.xlu0 %v3268_v51  ;;  %3266 = vmax.xlane.f32.xlu1 %v3265_v52 }
 0x278   :  { %v6516_v7 = vpop.f32.mrb[12].mxu0  ;;  %v6518_v54 = vpop.f32.mrb[20].mxu1 }
 0x279   :  { %v5609_v43 = vpop.f32.mrb[13].mxu0  ;;  %v5614_v44 = vpop.f32.mrb[21].mxu1  ;;  %v3274_v56 = vsel %vm2024_vm2, %v6518_v54, -inf  ;;  %v3271_v58 = vsel %vm2024_vm2, %v6516_v7, -inf }
 0x27a   :  { %3275 = vmax.xlane.f32.xlu0 %v3274_v56  ;;  %3272 = vmax.xlane.f32.xlu1 %v3271_v58 }
 0x27c   :  { %v6524_v17 = vpop.f32.mrb[14].mxu0  ;;  %v6526_v47 = vpop.f32.mrb[22].mxu1 }
 0x27d   :  { %v5619_v21 = vpop.f32.mrb[15].mxu0  ;;  %v5624_v4 = vpop.f32.mrb[23].mxu1  ;;  %v3280_v28 = vsel %vm2024_vm2, %v6526_v47, -inf  ;;  %v3277_v6 = vsel %vm2024_vm2, %v6524_v17, -inf }
 0x27e   :  { %3281 = vmax.xlane.f32.xlu0 %v3280_v28  ;;  %3278 = vmax.xlane.f32.xlu1 %v3277_v6 }
 0x280   :  { %v6532_v16 = vpop.f32.mrb[16].mxu0  ;;  %v6534_v36 = vpop.f32.mrb[24].mxu1 }
 0x281   :  { %v5629_v37 = vpop.f32.mrb[17].mxu0  ;;  %v5634_v24 = vpop.f32.mrb[25].mxu1  ;;  %v3286_v18 = vsel %vm2024_vm2, %v6534_v36, -inf  ;;  %v3283_v31 = vsel %vm2024_vm2, %v6532_v16, -inf }
 0x282   :  { %3287 = vmax.xlane.f32.xlu0 %v3286_v18  ;;  %3284 = vmax.xlane.f32.xlu1 %v3283_v31 }
 0x293   :  { %1472 = vrot.lane.b32.xlu1 %v6027_v35, %s5839_s2 }
 0x298   :  { %1460 = vrot.lane.b32.xlu0 %v6027_v35, %s5837_s3 }
 0x2e6   :  { %v3243_v2 = vpop.xlane.xlu0 %3242 }
 0x2e7   :  { %v3289_v3 = vsub.f32 %v6476_v11, %v3243_v2 }
 0x2e9   :  { %v3305_v42 = vmul.f32 1.442695, %v3289_v3 }
 0x2ea   :  { %v3249_v59 = vpop.xlane.xlu0 %3248  ;;  %v3246_v22 = vpop.xlane.xlu1 %3245 }
 0x2eb   :  { %5773 = vpow2.f32 %v3305_v42  ;;  %v3291_v40 = vsub.f32 %v6480_v55, %v3249_v59  ;;  %v3290_v61 = vsub.f32 %v6482_v38, %v3246_v22 }
 0x2ed   :  { %v3309_v62 = vmul.f32 1.442695, %v3291_v40  ;;  %v3307_v57 = vmul.f32 1.442695, %v3290_v61 }
 0x2ee   :  { %v3252_v8 = vpop.xlane.xlu0 %3251 }
 0x2ef   :  { %5775 = vpow2.f32 %v3309_v62  ;;  %v3292_v39 = vsub.f32 %v6488_v63, %v3252_v8 }
 0x2f0   :  { %5777 = vpow2.f32 %v3307_v57 }
 0x2f1   :  { %v3311_v14 = vmul.f32 1.442695, %v3292_v39 }
 0x2f3   :  { %5779 = vpow2.f32 %v3311_v14 }
 0x2f5   :  { %v6556_v12 = vpop.eup %5773 }
 0x2f6   :  { %v3337_v11 = vsel %vm2024_vm2, %v6556_v12, 0.0 }
 0x2f7   :  { %v3255_v5 = vpop.xlane.xlu1 %3254  ;;  %3338 = vadd.xlane.f32.xlu1 %v3337_v11 }
 0x2f8   :  { %v3293_v55 = vsub.f32 %v6492_v20, %v3255_v5 }
 0x2f9   :  { %v6561_v0 = vpop.eup %5775 }
 0x2fa   :  { %v6563_v38 = vpop.eup %5777  ;;  %v3258_v1 = vpop.xlane.xlu0 %3257  ;;  %v3313_v25 = vmul.f32 1.442695, %v3293_v55  ;;  %v3343_v63 = vsel %vm2024_vm2, %v6561_v0, 0.0 }
 0x2fb   :  { %3344 = vadd.xlane.f32.xlu1 %v3343_v63  ;;  %v3340_v49 = vsel %vm2024_vm2, %v6563_v38, 0.0  ;;  %v3294_v15 = vsub.f32 %v6496_v27, %v3258_v1 }
 0x2fc   :  { %5781 = vpow2.f32 %v3313_v25  ;;  %3341 = vadd.xlane.f32.xlu0 %v3340_v49 }
 0x2fd   :  { %v6569_v30 = vpop.eup %5779  ;;  %v3315_v21 = vmul.f32 1.442695, %v3294_v15 }
 0x2fe   :  { %v3346_v20 = vsel %vm2024_vm2, %v6569_v30, 0.0 }
 0x2ff   :  { %v3264_v51 = vpop.xlane.xlu0 %3263  ;;  %v3261_v52 = vpop.xlane.xlu1 %3260 }
 0x300   :  { %v3296_v43 = vsub.f32 %v6502_v45, %v3264_v51  ;;  %v3295_v44 = vsub.f32 %v6500_v19, %v3261_v52  ;;  %3347 = vadd.xlane.f32.xlu0 %v3346_v20 }
 0x302   :  { %v3319_v56 = vmul.f32 1.442695, %v3296_v43  ;;  %v3317_v58 = vmul.f32 1.442695, %v3295_v44 }
 0x303   :  { %v3270_v4 = vpop.xlane.xlu0 %3269  ;;  %v3267_v28 = vpop.xlane.xlu1 %3266 }
 0x304   :  { %5783 = vpow2.f32 %v3319_v56  ;;  %v3298_v6 = vsub.f32 %v6510_v26, %v3270_v4  ;;  %v3297_v37 = vsub.f32 %v6508_v13, %v3267_v28 }
 0x305   :  { %5785 = vpow2.f32 %v3317_v58 }
 0x306   :  { %v6578_v24 = vpop.eup %5781  ;;  %v3323_v27 = vmul.f32 1.442695, %v3298_v6  ;;  %5787 = vpow2.f32 %v3315_v21  ;;  %v3321_v18 = vmul.f32 1.442695, %v3297_v37  ;;  %v1548_v37 = vcombine.low %v6019_v34, %v6544_v48 }
 0x307   :  { %v3273_v45 = vpop.xlane.xlu1 %3272  ;;  %v3349_v19 = vsel %vm2024_vm2, %v6578_v24, 0.0  ;;  %v3276_v31 = vpop.xlane.xlu0 %3275 }
 0x308   :  { %5789 = vpow2.f32 %v3323_v27  ;;  %v3299_v2 = vsub.f32 %v6516_v7, %v3273_v45  ;;  %3350 = vadd.xlane.f32.xlu1 %v3349_v19  ;;  %v3300_v26 = vsub.f32 %v6518_v54, %v3276_v31  ;;  %v1549_v27 = vcombine.high %v6019_v34, %v6544_v48 }
 0x309   :  { %5791 = vpow2.f32 %v3321_v18  ;;  %v1565_v18 = vcombine.high %v6546_v60, %v6548_v41  ;;  %v1556_v45 = vrot.slane %v1548_v37, %v6033_v46 }
 0x30a   :  { %v3325_v3 = vmul.f32 1.442695, %v3299_v2  ;;  %v3327_v61 = vmul.f32 1.442695, %v3300_v26  ;;  %v1563_v31 = vrot.slane %v1549_v27, %v6033_v46 }
 0x30b   :  { %v3279_v13 = vpop.xlane.xlu1 %3278  ;;  %v3282_v7 = vpop.xlane.xlu0 %3281  ;;  %v1579_v2 = vrot.slane %v1565_v18, %v6033_v46 }
 0x30c   :  { %v3301_v42 = vsub.f32 %v6524_v17, %v3279_v13  ;;  %5793 = vpow2.f32 %v3325_v3  ;;  %v3302_v14 = vsub.f32 %v6526_v47, %v3282_v7 }
 0x30d   :  { %v1596_v13 = vcombine.low %v1563_v31, %v1579_v2 }
 0x30e   :  { %v6585_v59 = vpop.eup %5783  ;;  %v3329_v22 = vmul.f32 1.442695, %v3301_v42  ;;  %v1597_v42 = vcombine.high %v1563_v31, %v1579_v2 }
 0x30f   :  { %v6587_v40 = vpop.eup %5785  ;;  %v3358_v62 = vsel %vm2024_vm2, %v6585_v59, 0.0  ;;  %v3285_v57 = vpop.xlane.xlu1 %3284  ;;  %v1604_v48 = vrot.slane %v1596_v13, %v6037_v53 }
 0x310   :  { %3359 = vadd.xlane.f32.xlu1 %v3358_v62  ;;  %v3355_v54 = vsel %vm2024_vm2, %v6587_v40, 0.0  ;;  %v3303_v8 = vsub.f32 %v6532_v16, %v3285_v57  ;;  %v6594_v39 = vpop.eup %5787  ;;  %5795 = vpow2.f32 %v3329_v22  ;;  %v3331_v16 = vmul.f32 1.442695, %v3302_v14  ;;  %v3288_v58 = vpop.xlane.xlu0 %3287 }
 0x311   :  { %3356 = vadd.xlane.f32.xlu0 %v3355_v54  ;;  %5797 = vpow2.f32 %v3327_v61  ;;  %v3352_v55 = vsel %vm2024_vm2, %v6594_v39, 0.0  ;;  %v3304_v21 = vsub.f32 %v6534_v36, %v3288_v58  ;;  %v1564_v36 = vcombine.low %v6546_v60, %v6548_v41 }
 0x312   :  { %v6596_v17 = vpop.eup %5789  ;;  %v3333_v11 = vmul.f32 1.442695, %v3303_v8  ;;  %v1611_v60 = vrot.slane %v1597_v42, %v6037_v53 }
 0x313   :  { %v3364_v5 = vsel %vm2024_vm2, %v6596_v17, 0.0  ;;  %v6603_v1 = vpop.eup %5791  ;;  %v3335_v4 = vmul.f32 1.442695, %v3304_v21  ;;  %v1572_v19 = vrot.slane %v1564_v36, %v6033_v46  ;;  %v1473_v34 = vpop.permute.xlu1 %1472 }
 0x314   :  { %3365 = vadd.xlane.f32.xlu1 %v3364_v5  ;;  %5799 = vpow2.f32 %v3333_v11  ;;  %v3361_v25 = vsel %vm2024_vm2, %v6603_v1, 0.0  ;;  %v1836_v7 = vcombine.low %v1604_v48, %v1611_v60  ;;  %v5385_v54 = vcombine.high %v1604_v48, %v1611_v60  ;;  %v1461_v8 = vpop.permute.xlu0 %1460 }
 0x315   :  { %3353 = vadd.xlane.f32.xlu0 %v3352_v55  ;;  %5801 = vpow2.f32 %v3331_v16  ;;  %v1580_v26 = vcombine.low %v1556_v45, %v1572_v19  ;;  %v1581_v3 = vcombine.high %v1556_v45, %v1572_v19 }
 0x316   :  { %v6607_v63 = vpop.eup %5793  ;;  %5803 = vpow2.f32 %v3335_v4  ;;  %v6661_v55 = vrot.slane %v1836_v7, %v6033_v46  ;;  %v6664_v16 = vrot.slane %v5385_v54, %v6033_v46 }
 0x317   :  { %v3367_v49 = vsel %vm2024_vm2, %v6607_v63, 0.0  ;;  %v1588_v22 = vrot.slane %v1580_v26, %v6037_v53  ;;  %v1595_v61 = vrot.slane %v1581_v3, %v6037_v53 }
 0x318   :  { %v1868_v21 = vcombine.low %v6661_v55, %v6664_v16  ;;  %v1869_v33 = vcombine.high %v6661_v55, %v6664_v16 }
 0x319   :  { %3362 = vadd.xlane.f32.xlu0 %v3361_v25  ;;  %v1820_v41 = vcombine.low %v1588_v22, %v1595_v61  ;;  %v5384_v57 = vcombine.high %v1588_v22, %v1595_v61 }
 0x31a   :  { %v6609_v47 = vpop.eup %5795  ;;  %v1876_v18 = vrot.slane %v1868_v21, %v6037_v53 }
 0x31b   :  { %v3373_v20 = vsel %vm2024_vm2, %v6609_v47, 0.0  ;;  %v6615_v15 = vpop.eup %5797  ;;  %v6655_v14 = vrot.slane %v1820_v41, %v6033_v46  ;;  %v6658_v5 = vrot.slane %v5384_v57, %v6033_v46 }
 0x31c   :  { %3374 = vadd.xlane.f32.xlu1 %v3373_v20  ;;  %v3370_v51 = vsel %vm2024_vm2, %v6615_v15, 0.0  ;;  %v1632_v20 = vcombine.low %v6550_v50, %v1473_v34 }
 0x31d   :  { %3368 = vadd.xlane.f32.xlu0 %v3367_v49  ;;  %v1616_v49 = vcombine.low %v6027_v35, %v1461_v8  ;;  %v1852_v58 = vcombine.low %v6655_v14, %v6658_v5 }
 0x31e   :  { %v6619_v52 = vpop.eup %5799 }
 0x31f   :  { %v3379_v43 = vsel %vm2024_vm2, %v6619_v52, 0.0  ;;  %v6623_v44 = vpop.eup %5801  ;;  %v1624_v4 = vrot.slane %v1616_v49, %v6033_v46 }
 0x320   :  { %v3376_v56 = vsel %vm2024_vm2, %v6623_v44, 0.0  ;;  %v6632_v28 = vpop.eup %5803 }
 0x321   :  { %3371 = vadd.xlane.f32.xlu0 %v3370_v51  ;;  %v3382_v6 = vsel %vm2024_vm2, %v6632_v28, 0.0  ;;  %v1617_v51 = vcombine.high %v6027_v35, %v1461_v8  ;;  %v1883_v8 = vrot.slane %v1869_v33, %v6037_v53 }
 0x323   :  { %v1631_v36 = vrot.slane %v1617_v51, %v6033_v46 }
 0x325   :  { %3380 = vadd.xlane.f32.xlu0 %v3379_v43  ;;  %v1633_v43 = vcombine.high %v6550_v50, %v1473_v34  ;;  %v1860_v50 = vrot.slane %v1852_v58, %v6037_v53 }
 0x327   :  { %v1647_v27 = vrot.slane %v1633_v43, %v6033_v46  ;;  %v1884_v22 = vcombine.low %v1860_v50, %v1876_v18  ;;  %v1885_v41 = vcombine.high %v1860_v50, %v1876_v18 }
 0x329   :  { %3377 = vadd.xlane.f32.xlu0 %v3376_v56  ;;  %v1664_v2 = vcombine.low %v1631_v36, %v1647_v27  ;;  %v1665_v26 = vcombine.high %v1631_v36, %v1647_v27 }
 0x32d   :  { %1462 = vrot.lane.b32.xlu1 %v6013_v32, %s5837_s3 }
 0x33f   :  { %1450 = vrot.lane.b32.xlu0 %v6013_v32, %s5838_s28 }
 0x351   :  { %3383 = vadd.xlane.f32.xlu1 %v3382_v6  ;;  %v1640_v6 = vrot.slane %v1632_v20, %v6033_v46 }
 0x353   :  { %v1648_v45 = vcombine.low %v1624_v4, %v1640_v6  ;;  %v1649_v19 = vcombine.high %v1624_v4, %v1640_v6 }
 0x355   :  { %v1656_v61 = vrot.slane %v1648_v45, %v6037_v53  ;;  %v1663_v34 = vrot.slane %v1649_v19, %v6037_v53 }
 0x357   :  { %v1888_v60 = vcombine.low %v1656_v61, %v1663_v34  ;;  %v5386_v9 = vcombine.high %v1656_v61, %v1663_v34 }
 0x362   :  { %1474 = vrot.lane.b32.xlu1 %v6013_v32, %s5839_s2 }
 0x384   :  { %v3339_v62 = vpop.xlane.xlu1 %3338 }
 0x385   :  { %5805 = vrcp.f32 %v3339_v62  ;;  %v1853_v62 = vcombine.high %v6655_v14, %v6658_v5  ;;  %v1903_v14 = vrot.slane %v5386_v9, %v6033_v46 }
 0x387   :  { %v1867_v54 = vrot.slane %v1853_v62, %v6037_v53 }
 0x388   :  { %v3345_v11 = vpop.xlane.xlu1 %3344 }
 0x389   :  { %v3342_v25 = vpop.xlane.xlu0 %3341  ;;  %5807 = vrcp.f32 %v3345_v11  ;;  %v1886_v20 = vcombine.low %v1867_v54, %v1883_v8 }
 0x38a   :  { %5809 = vrcp.f32 %v3342_v25 }
 0x38d   :  { %v3348_v56 = vpop.xlane.xlu0 %3347 }
 0x38e   :  { %5811 = vrcp.f32 %v3348_v56 }
 0x38f   :  { %v5806_v37 = vpop.eup %5805 }
 0x390   :  { %v6679_v35 = vmul.f32 %v5806_v37, %v6556_v12 }
 0x392   :  { %5638 = vmatmul.mubr.msk.f32.vlgmr.msra.gmra.mrb[18].mxu0 %vm2024_vm2, %v6679_v35 }
 0x393   :  { %v5808_v31 = vpop.eup %5807  ;;  %5646 = vmatpush3.msra.mxu0 %v1818_v29  ;;  %5647 = vmatprep.mubr.msk.f32.mxu0 %vm5841_vm1, %v5840_v23  ;;  %v1672_v29 = vrot.slane %v1664_v2, %v6037_v53 }
 0x394   :  { %v5810_v12 = vpop.eup %5809  ;;  %v6691_v3 = vmul.f32 %v5808_v31, %v6561_v0  ;;  %5655 = vmatprep.subr.mxu0 %v5840_v23  ;;  %v1679_v0 = vrot.slane %v1665_v26, %v6037_v53 }
 0x395   :  { %v6695_v13 = vmul.f32 %v5810_v12, %v6563_v38  ;;  %v3351_v42 = vpop.xlane.xlu1 %3350 }
 0x396   :  { %5813 = vrcp.f32 %v3351_v42  ;;  %5648 = vmatmul.mubr.msk.f32.vlgmr.msra.gmra.mrb[20].mxu0 %vm2024_vm2, %v6691_v3  ;;  %v5387_v57 = vcombine.high %v1672_v29, %v1679_v0  ;;  %v5311_v62 = vsel %vm2024_vm2, %v6691_v3, 0.0 }
 0x397   :  { %5643 = vmatmul.mubr.msk.f32.vlgmr.msra.gmra.mrb[26].mxu1 %vm2024_vm2, %v6695_v13  ;;  %5656 = vmatpush3.msra.mxu0 %v1884_v22 }
 0x398   :  { %v5812_v38 = vpop.eup %5811  ;;  %5651 = vmatpush3.msra.mxu1 %v1819_v10  ;;  %5652 = vmatprep.mubr.msk.f32.mxu1 %vm5841_vm1, %v5840_v23  ;;  %v1904_v10 = vcombine.low %v1672_v29, %v1679_v0  ;;  %v1919_v5 = vrot.slane %v5387_v57, %v6033_v46 }
 0x399   :  { %v6711_v48 = vmul.f32 %v5812_v38, %v6569_v30  ;;  %5660 = vmatprep.subr.mxu1 %v5840_v23  ;;  %5657 = vmatprep.mubr.msk.f32.mxu0 %vm5841_vm1, %v5840_v23  ;;  %v1895_v30 = vrot.slane %v1888_v60, %v6033_v46  ;;  %v5308_v60 = vsel %vm2024_vm2, %v6679_v35, 0.0 }
 0x39a   :  { %5665 = vmatprep.subr.mxu0 %v5840_v23  ;;  %v1911_v11 = vrot.slane %v1904_v10, %v6033_v46 }
 0x39b   :  { %5653 = vmatmul.mubr.msk.f32.vlgmr.msra.gmra.mrb[28].mxu1 %vm2024_vm2, %v6711_v48  ;;  %v1920_v51 = vcombine.low %v1895_v30, %v1903_v14  ;;  %v1921_v27 = vcombine.high %v1895_v30, %v1903_v14 }
 0x39c   :  { %5661 = vmatpush3.msra.mxu1 %v1885_v41  ;;  %5662 = vmatprep.mubr.msk.f32.mxu1 %vm5841_vm1, %v5840_v23  ;;  %v1936_v43 = vcombine.low %v1911_v11, %v1919_v5  ;;  %v1937_v50 = vcombine.high %v1911_v11, %v1919_v5 }
 0x39d   :  { %5670 = vmatprep.subr.mxu1 %v5840_v23  ;;  %v3360_v16 = vpop.xlane.xlu1 %3359  ;;  %v1935_v2 = vrot.slane %v1921_v27, %v6037_v53 }
 0x39e   :  { %v3357_v7 = vpop.xlane.xlu0 %3356  ;;  %v1944_v21 = vrot.slane %v1936_v43, %v6037_v53  ;;  %v1951_v26 = vrot.slane %v1937_v50, %v6037_v53 }
 0x39f   :  { %5815 = vrcp.f32 %v3357_v7 }
 0x3a0   :  { %v5814_v55 = vpop.eup %5813  ;;  %v1954_v34 = vcombine.low %v1935_v2, %v1951_v26 }
 0x3a1   :  { %v6733_v25 = vmul.f32 %v5814_v55, %v6578_v24  ;;  %v3366_v56 = vpop.xlane.xlu1 %3365  ;;  %v1928_v24 = vrot.slane %v1920_v51, %v6037_v53 }
 0x3a2   :  { %v3354_v49 = vpop.xlane.xlu0 %3353 }
 0x3a3   :  { %5817 = vrcp.f32 %v3354_v49  ;;  %5658 = vmatmul.mubr.msk.f32.vlgmr.msra.gmra.mrb[22].mxu0 %vm2024_vm2, %v6733_v25  ;;  %v1952_v36 = vcombine.low %v1928_v24, %v1944_v21  ;;  %v1953_v61 = vcombine.high %v1928_v24, %v1944_v21  ;;  %v5315_v33 = vsel %vm2024_vm2, %v6733_v25, 0.0 }
 0x3a4   :  { %5666 = vmatpush3.msra.mxu0 %v1886_v20  ;;  %5667 = vmatprep.mubr.msk.f32.mxu0 %vm5841_vm1, %v5840_v23  ;;  %5819 = vrcp.f32 %v3360_v16 }
 0x3a5   :  { %5675 = vmatprep.subr.mxu0 %v5840_v23 }
 0x3a6   :  { %v3363_v58 = vpop.xlane.xlu0 %3362 }
 0x3a7   :  { %5821 = vrcp.f32 %v3363_v58 }
 0x3a8   :  { %5823 = vrcp.f32 %v3366_v56 }
 0x3a9   :  { %v5816_v4 = vpop.eup %5815 }
 0x3aa   :  { %v3407_v6 = vmul.f32 %v5816_v4, %v6587_v40  ;;  %v3369_v37 = vpop.xlane.xlu0 %3368  ;;  %v1887_v40 = vcombine.high %v1867_v54, %v1883_v8  ;;  %v3375_v8 = vpop.xlane.xlu1 %3374 }
 0x3ab   :  { %5825 = vrcp.f32 %v3369_v37 }
 0x3ac   :  { %5668 = vmatmul.mubr.msk.f32.vlgmr.msra.gmra.mrb[24].mxu0 %vm2024_vm2, %v3407_v6  ;;  %v5319_v7 = vsel %vm2024_vm2, %v3407_v6, 0.0 }
 0x3ad   :  { %v5818_v18 = vpop.eup %5817  ;;  %5676 = vmatpush3.msra.mxu0 %v1952_v36  ;;  %5677 = vmatprep.mubr.msk.f32.mxu0 %vm5841_vm1, %v5840_v23 }
 0x3ae   :  { %v3406_v45 = vmul.f32 %v5818_v18, %v6594_v39  ;;  %v3372_v19 = vpop.xlane.xlu0 %3371  ;;  %5685 = vmatprep.subr.mxu0 %v5840_v23  ;;  %v5820_v31 = vpop.eup %5819 }
 0x3af   :  { %5827 = vrcp.f32 %v3372_v19  ;;  %v3408_v42 = vmul.f32 %v5820_v31, %v6585_v59  ;;  %v1955_v59 = vcombine.high %v1935_v2, %v1951_v26  ;;  %v1463_v25 = vpop.permute.xlu1 %1462 }
 0x3b0   :  { %5663 = vmatmul.mubr.msk.f32.vlgmr.msra.gmra.mrb[30].mxu1 %vm2024_vm2, %v3406_v45  ;;  %v5317_v10 = vsel %vm2024_vm2, %v3406_v45, 0.0  ;;  %5829 = vrcp.f32 %v3375_v8  ;;  %v1684_v37 = vcombine.low %v6013_v32, %v1463_v25  ;;  %v1685_v36 = vcombine.high %v6013_v32, %v1463_v25 }
 0x3b1   :  { %v5822_v12 = vpop.eup %5821  ;;  %5671 = vmatpush3.msra.mxu1 %v1887_v40  ;;  %5672 = vmatprep.mubr.msk.f32.mxu1 %vm5841_vm1, %v5840_v23  ;;  %v5321_v14 = vsel %vm2024_vm2, %v3408_v42, 0.0 }
 0x3b2   :  { %v3409_v39 = vmul.f32 %v5822_v12, %v6603_v1  ;;  %5680 = vmatprep.subr.mxu1 %v5840_v23  ;;  %v5824_v22 = vpop.eup %5823  ;;  %v3381_v30 = vpop.xlane.xlu0 %3380  ;;  %v1699_v2 = vrot.slane %v1685_v36, %v6033_v46 }
 0x3b3   :  { %v3410_v0 = vmul.f32 %v5824_v22, %v6596_v17  ;;  %v5309_v17 = vsel %vm2024_vm2, %v6695_v13, 0.0 }
 0x3b4   :  { %5673 = vmatmul.mubr.msk.f32.vlgmr.msra.gmra.mrb[32].mxu1 %vm2024_vm2, %v3408_v42  ;;  %5678 = vmatmul.mubr.msk.f32.vlgmr.msra.gmra.mrb[26].mxu0 %vm2024_vm2, %v3409_v39  ;;  %v5310_v41 = vadd.f32 %v5309_v17, %v5308_v60 }
 0x3b5   :  { %v5826_v29 = vpop.eup %5825  ;;  %5681 = vmatpush3.msra.mxu1 %v1953_v61  ;;  %5686 = vmatpush3.msra.mxu0 %v1954_v34  ;;  %v5325_v55 = vsel %vm2024_vm2, %v3410_v0, 0.0 }
 0x3b6   :  { %v3411_v38 = vmul.f32 %v5826_v29, %v6607_v63  ;;  %5682 = vmatprep.mubr.msk.f32.mxu1 %vm5841_vm1, %v5840_v23  ;;  %5687 = vmatprep.mubr.msk.f32.mxu0 %vm5841_vm1, %v5840_v23  ;;  %v5312_v13 = vadd.f32 %v5311_v62, %v5310_v41  ;;  %v3378_v3 = vpop.xlane.xlu0 %3377 }
 0x3b7   :  { %5690 = vmatprep.subr.mxu1 %v5840_v23  ;;  %5695 = vmatprep.subr.mxu0 %v5840_v23  ;;  %5831 = vrcp.f32 %v3378_v3 }
 0x3b8   :  { %5683 = vmatmul.mubr.msk.f32.vlgmr.msra.gmra.mrb[34].mxu1 %vm2024_vm2, %v3410_v0  ;;  %5688 = vmatmul.mubr.msk.f32.vlgmr.msra.gmra.mrb[28].mxu0 %vm2024_vm2, %v3411_v38  ;;  %5833 = vrcp.f32 %v3381_v30  ;;  %v5327_v20 = vsel %vm2024_vm2, %v3411_v38, 0.0 }
 0x3b9   :  { %v5828_v1 = vpop.eup %5827  ;;  %5691 = vmatpush3.msra.mxu1 %v1955_v59  ;;  %5692 = vmatprep.mubr.msk.f32.mxu1 %vm5841_vm1, %v5840_v23 }
 0x3ba   :  { %v3412_v63 = vmul.f32 %v5828_v1, %v6615_v15  ;;  %5700 = vmatprep.subr.mxu1 %v5840_v23  ;;  %5697 = vmatprep.mubr.msk.f32.mxu0 %vm5841_vm1, %v5840_v23  ;;  %v5313_v15 = vsel %vm2024_vm2, %v6711_v48, 0.0  ;;  %v5323_v48 = vsel %vm2024_vm2, %v3409_v39, 0.0  ;;  %v5830_v49 = vpop.eup %5829  ;;  %v1451_v27 = vpop.permute.xlu0 %1450 }
 0x3bb   :  { %v5314_v9 = vadd.f32 %v5313_v15, %v5312_v13  ;;  %v3413_v24 = vmul.f32 %v5830_v49, %v6609_v47 }
 0x3bc   :  { %5693 = vmatmul.mubr.msk.f32.vlgmr.msra.gmra.mrb[36].mxu1 %vm2024_vm2, %v3412_v63  ;;  %v5329_v56 = vsel %vm2024_vm2, %v3412_v63, 0.0 }
 0x3bd   :  { %5702 = vmatprep.mubr.msk.f32.mxu1 %vm5841_vm1, %v5840_v23  ;;  %v5316_v35 = vadd.f32 %v5315_v33, %v5314_v9  ;;  %v5331_v18 = vsel %vm2024_vm2, %v3413_v24, 0.0 }
 0x3bf   :  { %v5318_v57 = vadd.f32 %v5317_v10, %v5316_v35 }
 0x3c1   :  { %v5320_v54 = vadd.f32 %v5319_v7, %v5318_v57  ;;  %v5832_v51 = vpop.eup %5831 }
 0x3c2   :  { %v3414_v21 = vmul.f32 %v5832_v51, %v6623_v44  ;;  %v5834_v6 = vpop.eup %5833  ;;  %v1692_v44 = vrot.slane %v1684_v37, %v6033_v46 }
 0x3c3   :  { %v5322_v11 = vadd.f32 %v5321_v14, %v5320_v54  ;;  %v3415_v40 = vmul.f32 %v5834_v6, %v6619_v52 }
 0x3c4   :  { %v5333_v45 = vsel %vm2024_vm2, %v3414_v21, 0.0 }
 0x3c5   :  { %v5324_v5 = vadd.f32 %v5323_v48, %v5322_v11  ;;  %v5335_v34 = vsel %vm2024_vm2, %v3415_v40, 0.0 }
 0x3c7   :  { %v5326_v16 = vadd.f32 %v5325_v55, %v5324_v5 }
 0x3c9   :  { %v5328_v43 = vadd.f32 %v5327_v20, %v5326_v16 }
 0x3cb   :  { %v5330_v4 = vadd.f32 %v5329_v56, %v5328_v43 }
 0x3cd   :  { %v5332_v47 = vadd.f32 %v5331_v18, %v5330_v4 }
 0x3cf   :  { %v5334_v32 = vadd.f32 %v5333_v45, %v5332_v47 }
 0x3d1   :  { %v5336_v1 = vadd.f32 %v5335_v34, %v5334_v32 }
 0x3de   :  { %v3384_v58 = vpop.xlane.xlu1 %3383 }
 0x3df   :  { %5835 = vrcp.f32 %v3384_v58 }
 0x3e2   :  { %v1475_v50 = vpop.permute.xlu1 %1474 }
 0x3e3   :  { %v1700_v19 = vcombine.low %v1451_v27, %v1475_v50  ;;  %v1701_v31 = vcombine.high %v1451_v27, %v1475_v50 }
 0x3e5   :  { %v1708_v26 = vrot.slane %v1700_v19, %v6033_v46  ;;  %v1715_v12 = vrot.slane %v1701_v31, %v6033_v46 }
 0x3e7   :  { %v1716_v42 = vcombine.low %v1692_v44, %v1708_v26  ;;  %v1717_v39 = vcombine.high %v1692_v44, %v1708_v26  ;;  %v1732_v22 = vcombine.low %v1699_v2, %v1715_v12  ;;  %v1733_v61 = vcombine.high %v1699_v2, %v1715_v12 }
 0x3e9   :  { %v5836_v29 = vpop.eup %5835  ;;  %v1724_v0 = vrot.slane %v1716_v42, %v6037_v53  ;;  %v1731_v52 = vrot.slane %v1717_v39, %v6037_v53  ;;  %v1740_v38 = vrot.slane %v1732_v22, %v6037_v53  ;;  %v1747_v59 = vrot.slane %v1733_v61, %v6037_v53 }
 0x3ea   :  { %v3416_v17 = vmul.f32 %v5836_v29, %v6632_v28 }
 0x3eb   :  { %v1956_v63 = vcombine.low %v1724_v0, %v1731_v52  ;;  %v5388_v60 = vcombine.high %v1724_v0, %v1731_v52  ;;  %v1972_v41 = vcombine.low %v1740_v38, %v1747_v59  ;;  %v5389_v62 = vcombine.high %v1740_v38, %v1747_v59 }
 0x3ec   :  { %v5337_v13 = vsel %vm2024_vm2, %v3416_v17, 0.0 }
 0x3ed   :  { %v5338_v15 = vadd.f32 %v5337_v13, %v5336_v1  ;;  %v1963_v33 = vrot.slane %v1956_v63, %v6033_v46  ;;  %v1971_v9 = vrot.slane %v5388_v60, %v6033_v46  ;;  %v1979_v10 = vrot.slane %v1972_v41, %v6033_v46 }
 0x3ee   :  { %v1987_v35 = vrot.slane %v5389_v62, %v6033_v46 }
 0x3ef   :  { %v5339_v57 = vsel %vm2024_vm2, %v5338_v15, 0.0  ;;  %v1988_v30 = vcombine.low %v1963_v33, %v1971_v9  ;;  %v1989_v7 = vcombine.high %v1963_v33, %v1971_v9 }
 0x3f0   :  { %5340 = vst [vmem:[%s7000_s10] sm:$0xff] %v5339_v57  ;;  %v2004_v28 = vcombine.low %v1979_v10, %v1987_v35  ;;  %v2005_v54 = vcombine.high %v1979_v10, %v1987_v35  ;;  %s5844_s10 = smov 8  }
 0x3f1   :  { %v1996_v8 = vrot.slane %v1988_v30, %v6037_v53  ;;  %v2003_v3 = vrot.slane %v1989_v7, %v6037_v53 }
 0x3f2   :  { %v2012_v14 = vrot.slane %v2004_v28, %v6037_v53  ;;  %v2019_v11 = vrot.slane %v2005_v54, %v6037_v53 }
 0x3f4   :  { %v2020_v48 = vcombine.low %v1996_v8, %v2012_v14  ;;  %v2021_v5 = vcombine.high %v1996_v8, %v2012_v14  ;;  %v2022_v55 = vcombine.low %v2003_v3, %v2019_v11  ;;  %v2023_v16 = vcombine.high %v2003_v3, %v2019_v11 }
 0x3f6   :  { %5696 = vmatpush3.msra.mxu0 %v2020_v48  ;;  %5701 = vmatpush3.msra.mxu1 %v2021_v5 }
 0x3f7   :  { %5698 = vmatmul.mubr.msk.f32.vlgmr.msra.gmra.mrb[30].mxu0 %vm2024_vm2, %v3413_v24  ;;  %5703 = vmatmul.mubr.msk.f32.vlgmr.msra.gmra.mrb[38].mxu1 %vm2024_vm2, %v3414_v21 }
 0x3f8   :  { %5705 = vmatprep.subr.mxu0 %v5840_v23  ;;  %5710 = vmatprep.subr.mxu1 %v5840_v23 }
 0x3f9   :  { %5706 = vmatpush3.msra.mxu0 %v2022_v55  ;;  %5711 = vmatpush3.msra.mxu1 %v2023_v16 }
 0x3fa   :  { %5707 = vmatprep.mubr.msk.f32.mxu0 %vm5841_vm1, %v5840_v23  ;;  %5712 = vmatprep.mubr.msk.f32.mxu1 %vm5841_vm1, %v5840_v23 }
 0x3fb   :  { %5708 = vmatmul.mubr.msk.f32.vlgmr.msra.gmra.mrb[32].mxu0 %vm2024_vm2, %v3415_v40  ;;  %5713 = vmatmul.mubr.msk.f32.vlgmr.msra.gmra.mrb[40].mxu1 %vm2024_vm2, %v3416_v17 }
 0x465   :  { %v3486_v25 = vpop.f32.mrb[18].mxu0 }
 0x466   :  { %v5639_v49 = vpop.f32.mrb[19].mxu0 }
 0x469   :  { %v3632_v20 = vpop.f32.mrb[20].mxu0 }
 0x46a   :  { %v3559_v51 = vpop.f32.mrb[26].mxu1  ;;  %v4585_v43 = vcombine.low %v3486_v25, %v3632_v20  ;;  %v4586_v56 = vcombine.high %v3486_v25, %v3632_v20  ;;  %v5649_v58 = vpop.f32.mrb[21].mxu0 }
 0x46b   :  { %v5644_v24 = vpop.f32.mrb[27].mxu1 }
 0x46c   :  { %v4593_v36 = vrot.slane %v4585_v43, %v6033_v46  ;;  %v4600_v23 = vrot.slane %v4586_v56, %v6033_v46 }
 0x46e   :  { %v3705_v21 = vpop.f32.mrb[28].mxu1 }
 0x46f   :  { %v4601_v4 = vcombine.low %v3559_v51, %v3705_v21  ;;  %v4602_v6 = vcombine.high %v3559_v51, %v3705_v21  ;;  %v5654_v37 = vpop.f32.mrb[29].mxu1 }
 0x471   :  { %v4609_v27 = vrot.slane %v4601_v4, %v6033_v46  ;;  %v4616_v50 = vrot.slane %v4602_v6, %v6033_v46 }
 0x473   :  { %v4617_v18 = vcombine.low %v4593_v36, %v4609_v27  ;;  %v4618_v45 = vcombine.high %v4593_v36, %v4609_v27  ;;  %v4633_v19 = vcombine.low %v4600_v23, %v4616_v50  ;;  %v4634_v31 = vcombine.high %v4600_v23, %v4616_v50 }
 0x475   :  { %v4625_v40 = vrot.slane %v4617_v18, %v6037_v53  ;;  %v4632_v47 = vrot.slane %v4618_v45, %v6037_v53  ;;  %v4641_v44 = vrot.slane %v4633_v19, %v6037_v53  ;;  %v4648_v2 = vrot.slane %v4634_v31, %v6037_v53 }
 0x476   :  { %v3778_v26 = vpop.f32.mrb[22].mxu0 }
 0x477   :  { %v4857_v12 = vcombine.low %v4625_v40, %v4632_v47  ;;  %v5438_v32 = vcombine.high %v4625_v40, %v4632_v47  ;;  %v4873_v42 = vcombine.low %v4641_v44, %v4648_v2  ;;  %v5439_v39 = vcombine.high %v4641_v44, %v4648_v2  ;;  %v5659_v22 = vpop.f32.mrb[23].mxu0 }
 0x479   :  { %v4864_v61 = vrot.slane %v4857_v12, %v6033_v46  ;;  %v4872_v34 = vrot.slane %v5438_v32, %v6033_v46  ;;  %v4880_v29 = vrot.slane %v4873_v42, %v6033_v46  ;;  %v4888_v0 = vrot.slane %v5439_v39, %v6033_v46 }
 0x47b   :  { %v4889_v52 = vcombine.low %v4864_v61, %v4872_v34  ;;  %v4905_v38 = vcombine.low %v4880_v29, %v4888_v0  ;;  %v4890_v59 = vcombine.high %v4864_v61, %v4872_v34  ;;  %v4906_v1 = vcombine.high %v4880_v29, %v4888_v0 }
 0x47d   :  { %v6847_v17 = vrot.slane %v4889_v52, %v6037_v53  ;;  %v6850_v63 = vrot.slane %v4905_v38, %v6037_v53  ;;  %v6853_v60 = vrot.slane %v4890_v59, %v6037_v53  ;;  %v6856_v41 = vrot.slane %v4906_v1, %v6037_v53 }
 0x47f   :  { %v3924_v62 = vpop.f32.mrb[24].mxu0  ;;  %v4921_v13 = vcombine.low %v6847_v17, %v6850_v63  ;;  %v4922_v15 = vcombine.high %v6847_v17, %v6850_v63  ;;  %v4923_v33 = vcombine.low %v6853_v60, %v6856_v41  ;;  %v4924_v9 = vcombine.high %v6853_v60, %v6856_v41 }
 0x480   :  { %v4653_v10 = vcombine.low %v3778_v26, %v3924_v62  ;;  %v4654_v35 = vcombine.high %v3778_v26, %v3924_v62  ;;  %v5669_v57 = vpop.f32.mrb[25].mxu0 }
 0x482   :  { %v4661_v48 = vrot.slane %v4653_v10, %v6033_v46  ;;  %v4668_v5 = vrot.slane %v4654_v35, %v6033_v46 }
 0x483   :  { %v3851_v30 = vpop.f32.mrb[30].mxu1 }
 0x484   :  { %v5664_v7 = vpop.f32.mrb[31].mxu1 }
 0x487   :  { %v3997_v28 = vpop.f32.mrb[32].mxu1  ;;  %v4070_v54 = vpop.f32.mrb[26].mxu0 }
 0x488   :  { %v4669_v8 = vcombine.low %v3851_v30, %v3997_v28  ;;  %v4670_v14 = vcombine.high %v3851_v30, %v3997_v28  ;;  %v5674_v3 = vpop.f32.mrb[33].mxu1  ;;  %v5679_v11 = vpop.f32.mrb[27].mxu0 }
 0x48a   :  { %v4677_v55 = vrot.slane %v4669_v8, %v6033_v46  ;;  %v4684_v16 = vrot.slane %v4670_v14, %v6033_v46 }
 0x48b   :  { %v4143_v25 = vpop.f32.mrb[34].mxu1  ;;  %v4216_v49 = vpop.f32.mrb[28].mxu0 }
 0x48c   :  { %v4685_v20 = vcombine.low %v4661_v48, %v4677_v55  ;;  %v4686_v51 = vcombine.high %v4661_v48, %v4677_v55  ;;  %v4701_v43 = vcombine.low %v4668_v5, %v4684_v16  ;;  %v4702_v56 = vcombine.high %v4668_v5, %v4684_v16  ;;  %v5684_v58 = vpop.f32.mrb[35].mxu1  ;;  %v5689_v24 = vpop.f32.mrb[29].mxu0 }
 0x48d   :  { %v4721_v21 = vcombine.low %v4070_v54, %v4216_v49  ;;  %v4722_v4 = vcombine.high %v4070_v54, %v4216_v49 }
 0x48e   :  { %v4693_v6 = vrot.slane %v4685_v20, %v6037_v53  ;;  %v4700_v37 = vrot.slane %v4686_v51, %v6037_v53  ;;  %v4709_v36 = vrot.slane %v4701_v43, %v6037_v53  ;;  %v4716_v23 = vrot.slane %v4702_v56, %v6037_v53 }
 0x48f   :  { %v4289_v27 = vpop.f32.mrb[36].mxu1  ;;  %v4729_v32 = vrot.slane %v4721_v21, %v6033_v46  ;;  %v4736_v42 = vrot.slane %v4722_v4, %v6033_v46 }
 0x490   :  { %v4925_v50 = vcombine.low %v4693_v6, %v4700_v37  ;;  %v5440_v18 = vcombine.high %v4693_v6, %v4700_v37  ;;  %v4941_v45 = vcombine.low %v4709_v36, %v4716_v23  ;;  %v5441_v19 = vcombine.high %v4709_v36, %v4716_v23  ;;  %v5694_v31 = vpop.f32.mrb[37].mxu1 }
 0x491   :  { %v4737_v40 = vcombine.low %v4143_v25, %v4289_v27  ;;  %v4738_v47 = vcombine.high %v4143_v25, %v4289_v27 }
 0x492   :  { %v4932_v44 = vrot.slane %v4925_v50, %v6033_v46  ;;  %v4940_v2 = vrot.slane %v5440_v18, %v6033_v46  ;;  %v4948_v26 = vrot.slane %v4941_v45, %v6033_v46  ;;  %v4956_v12 = vrot.slane %v5441_v19, %v6033_v46 }
 0x493   :  { %v4745_v39 = vrot.slane %v4737_v40, %v6033_v46  ;;  %v4752_v22 = vrot.slane %v4738_v47, %v6033_v46 }
 0x494   :  { %v4957_v61 = vcombine.low %v4932_v44, %v4940_v2  ;;  %v4973_v34 = vcombine.low %v4948_v26, %v4956_v12  ;;  %v4958_v29 = vcombine.high %v4932_v44, %v4940_v2  ;;  %v4974_v0 = vcombine.high %v4948_v26, %v4956_v12 }
 0x495   :  { %v4753_v52 = vcombine.low %v4729_v32, %v4745_v39  ;;  %v4754_v38 = vcombine.high %v4729_v32, %v4745_v39  ;;  %v4769_v59 = vcombine.low %v4736_v42, %v4752_v22  ;;  %v4770_v1 = vcombine.high %v4736_v42, %v4752_v22 }
 0x496   :  { %v6883_v62 = vrot.slane %v4957_v61, %v6037_v53  ;;  %v6886_v10 = vrot.slane %v4973_v34, %v6037_v53  ;;  %v4972_v35 = vrot.slane %v4958_v29, %v6037_v53  ;;  %v4988_v57 = vrot.slane %v4974_v0, %v6037_v53 }
 0x497   :  { %v4761_v30 = vrot.slane %v4753_v52, %v6037_v53  ;;  %v4768_v7 = vrot.slane %v4754_v38, %v6037_v53  ;;  %v4777_v28 = vrot.slane %v4769_v59, %v6037_v53  ;;  %v4784_v54 = vrot.slane %v4770_v1, %v6037_v53 }
 0x498   :  { %v4990_v8 = vcombine.high %v6883_v62, %v6886_v10  ;;  %v4989_v14 = vcombine.low %v6883_v62, %v6886_v10  ;;  %v4991_v3 = vcombine.low %v4972_v35, %v4988_v57  ;;  %v4992_v11 = vcombine.high %v4972_v35, %v4988_v57 }
 0x499   :  { %v4993_v48 = vcombine.low %v4761_v30, %v4768_v7  ;;  %v5442_v5 = vcombine.high %v4761_v30, %v4768_v7  ;;  %v5009_v55 = vcombine.low %v4777_v28, %v4784_v54  ;;  %v5443_v16 = vcombine.high %v4777_v28, %v4784_v54 }
 0x49a   :  { %v5733_v25 = vpack.i.bf16 %v4990_v8, %v4922_v15  ;;  %v5738_v49 = vpack.i.bf16 %v4991_v3, %v4923_v33  ;;  %v5753_v20 = vpack.i.bf16 %v4992_v11, %v4924_v9 }
 0x49b   :  { %v5000_v51 = vrot.slane %v4993_v48, %v6033_v46  ;;  %v5008_v43 = vrot.slane %v5442_v5, %v6033_v46  ;;  %v5016_v56 = vrot.slane %v5009_v55, %v6033_v46  ;;  %v5024_v58 = vrot.slane %v5443_v16, %v6033_v46 }
 0x49c   :  { %5734 = vrot.lane.b32.xlu0 %v5733_v25, %s5844_s10 }
 0x49d   :  { %v5025_v15 = vcombine.low %v5000_v51, %v5008_v43  ;;  %v5041_v24 = vcombine.low %v5016_v56, %v5024_v58  ;;  %v5026_v21 = vcombine.high %v5000_v51, %v5008_v43  ;;  %v5042_v4 = vcombine.high %v5016_v56, %v5024_v58  ;;  %v5771_v51 = vld [vmem:[%s7001_s7] sm:$0xff]  }
 0x49e   :  { %5715 = vmatprep.subr.bf16.mxu0 %v5771_v51 }
 0x49f   :  { %v6913_v33 = vrot.slane %v5025_v15, %v6037_v53  ;;  %v6916_v60 = vrot.slane %v5041_v24, %v6037_v53  ;;  %v5040_v41 = vrot.slane %v5026_v21, %v6037_v53  ;;  %v5056_v9 = vrot.slane %v5042_v4, %v6037_v53  ;;  %5716 = vmatpush3.bf16.msra.mxu0 %v5771_v51  ;;  %v5772_v4 = vld [vmem:[%s7001_s7 + $0x8] sm:$0xff]  }
 0x4a0   :  { %5739 = vrot.lane.b32.xlu0 %v5738_v49, %s5845_s13  ;;  %5717 = vmatprep.subr.bf16.mxu0 %v5772_v4 }
 0x4a1   :  { %v5057_v6 = vcombine.low %v6913_v33, %v6916_v60  ;;  %v5058_v37 = vcombine.high %v6913_v33, %v6916_v60  ;;  %v5059_v36 = vcombine.low %v5040_v41, %v5056_v9  ;;  %v5060_v23 = vcombine.high %v5040_v41, %v5056_v9  ;;  %v5446_v33 = vld [vmem:[%s7002_s8] ss:$0 sm:$0xff] }
 0x4a3   :  { %5718 = vmatpush3.bf16.msra.mxu0 %v5772_v4 }
 0x4a4   :  { %5754 = vrot.lane.b32.xlu0 %v5753_v20, %s5846_s14 }
 0x4ca   :  { %v4362_v27 = vpop.f32.mrb[30].mxu0  ;;  %v4435_v50 = vpop.f32.mrb[38].mxu1 }
 0x4cb   :  { %v5699_v18 = vpop.f32.mrb[31].mxu0  ;;  %v5704_v45 = vpop.f32.mrb[39].mxu1 }
 0x4ce   :  { %v4508_v19 = vpop.f32.mrb[32].mxu0  ;;  %v4581_v31 = vpop.f32.mrb[40].mxu1 }
 0x4cf   :  { %v4789_v40 = vcombine.low %v4362_v27, %v4508_v19  ;;  %v4790_v47 = vcombine.high %v4362_v27, %v4508_v19  ;;  %v4805_v44 = vcombine.low %v4435_v50, %v4581_v31  ;;  %v4806_v2 = vcombine.high %v4435_v50, %v4581_v31  ;;  %v5709_v26 = vpop.f32.mrb[33].mxu0  ;;  %v5714_v12 = vpop.f32.mrb[41].mxu1 }
 0x4d1   :  { %v4797_v32 = vrot.slane %v4789_v40, %v6033_v46  ;;  %v4804_v42 = vrot.slane %v4790_v47, %v6033_v46  ;;  %v4813_v39 = vrot.slane %v4805_v44, %v6033_v46  ;;  %v4820_v22 = vrot.slane %v4806_v2, %v6033_v46 }
 0x4d3   :  { %v4821_v61 = vcombine.low %v4797_v32, %v4813_v39  ;;  %v4822_v34 = vcombine.high %v4797_v32, %v4813_v39  ;;  %v4837_v29 = vcombine.low %v4804_v42, %v4820_v22  ;;  %v4838_v0 = vcombine.high %v4804_v42, %v4820_v22 }
 0x4d5   :  { %v4829_v52 = vrot.slane %v4821_v61, %v6037_v53  ;;  %v4836_v38 = vrot.slane %v4822_v34, %v6037_v53  ;;  %v4845_v59 = vrot.slane %v4837_v29, %v6037_v53  ;;  %v4852_v1 = vrot.slane %v4838_v0, %v6037_v53 }
 0x4d7   :  { %v5061_v35 = vcombine.low %v4829_v52, %v4836_v38  ;;  %v5444_v57 = vcombine.high %v4829_v52, %v4836_v38  ;;  %v5077_v30 = vcombine.low %v4845_v59, %v4852_v1  ;;  %v5445_v7 = vcombine.high %v4845_v59, %v4852_v1 }
 0x4d9   :  { %v5068_v28 = vrot.slane %v5061_v35, %v6033_v46  ;;  %v5076_v54 = vrot.slane %v5444_v57, %v6033_v46  ;;  %v5084_v8 = vrot.slane %v5077_v30, %v6033_v46  ;;  %v5092_v3 = vrot.slane %v5445_v7, %v6033_v46 }
 0x4db   :  { %v5093_v11 = vcombine.low %v5068_v28, %v5076_v54  ;;  %v5109_v48 = vcombine.low %v5084_v8, %v5092_v3  ;;  %v5094_v5 = vcombine.high %v5068_v28, %v5076_v54  ;;  %v5110_v55 = vcombine.high %v5084_v8, %v5092_v3 }
 0x4dd   :  { %v5101_v16 = vrot.slane %v5093_v11, %v6037_v53  ;;  %v5117_v25 = vrot.slane %v5109_v48, %v6037_v53  ;;  %v5108_v49 = vrot.slane %v5094_v5, %v6037_v53  ;;  %v5124_v20 = vrot.slane %v5110_v55, %v6037_v53 }
 0x4df   :  { %v5126_v43 = vcombine.high %v5101_v16, %v5117_v25  ;;  %v5125_v56 = vcombine.low %v5101_v16, %v5117_v25  ;;  %v5127_v58 = vcombine.low %v5108_v49, %v5124_v20  ;;  %v5128_v46 = vcombine.high %v5108_v49, %v5124_v20 }
 0x4e1   :  { %v5743_v15 = vpack.i.bf16 %v5126_v43, %v5058_v37  ;;  %v5748_v24 = vpack.i.bf16 %v5127_v58, %v5059_v36  ;;  %v5758_v21 = vpack.i.bf16 %v5128_v46, %v5060_v23 }
 0x4e3   :  { %5744 = vrot.lane.b32.xlu1 %v5743_v15, %s5844_s10 }
 0x4e7   :  { %5749 = vrot.lane.b32.xlu1 %v5748_v24, %s5845_s13 }
 0x4eb   :  { %5759 = vrot.lane.b32.xlu1 %v5758_v21, %s5846_s14 }
 0x50e   :  { %v5735_v53 = vpop.permute.xlu0 %5734 }
 0x50f   :  { %v5737_v9 = vunpack.i.h.bf16 %v5735_v53  ;;  %v5736_v27 = vunpack.i.l.bf16 %v5735_v53 }
 0x511   :  { %v5177_v23 = vsel %vm2024_vm2, %v4921_v13, %v5736_v27  ;;  %v5178_v18 = vsel %vm2024_vm2, %v4989_v14, %v5737_v9 }
 0x512   :  { %v5740_v41 = vpop.permute.xlu0 %5739 }
 0x513   :  { %v5742_v50 = vunpack.i.h.bf16 %v5740_v41  ;;  %v5741_v37 = vunpack.i.l.bf16 %v5740_v41 }
 0x515   :  { %v5182_v31 = vsel %vm5181_vm3, %v5177_v23, %v5741_v37  ;;  %v5183_v40 = vsel %vm5181_vm3, %v5178_v18, %v5742_v50 }
 0x516   :  { %v5755_v36 = vpop.permute.xlu0 %5754 }
 0x517   :  { %v5757_v45 = vunpack.i.h.bf16 %v5755_v36  ;;  %v5756_v19 = vunpack.i.l.bf16 %v5755_v36 }
 0x519   :  { %v5187_v47 = vsel %vm5186_vm4, %v5182_v31, %v5756_v19  ;;  %v5188_v44 = vsel %vm5186_vm4, %v5183_v40, %v5757_v45 }
 0x51a   :  { %v5191_v2 = vpack.c.bf16 %v5188_v44, %v5187_v47 }
 0x51c   :  { %5719 = vmatprep.mubr.msk.bf16.mxu0 %vm72_vm0, %v5191_v2 }
 0x555   :  { %v5745_v17 = vpop.permute.xlu1 %5744 }
 0x556   :  { %v5747_v13 = vunpack.i.h.bf16 %v5745_v17  ;;  %v5746_v26 = vunpack.i.l.bf16 %v5745_v17 }
 0x558   :  { %v5179_v12 = vsel %vm2024_vm2, %v5057_v6, %v5746_v26  ;;  %v5180_v32 = vsel %vm2024_vm2, %v5125_v56, %v5747_v13 }
 0x559   :  { %v5750_v63 = vpop.permute.xlu1 %5749 }
 0x55a   :  { %v5752_v62 = vunpack.i.h.bf16 %v5750_v63  ;;  %v5751_v10 = vunpack.i.l.bf16 %v5750_v63 }
 0x55c   :  { %v5184_v22 = vsel %vm5181_vm3, %v5179_v12, %v5751_v10  ;;  %v5185_v61 = vsel %vm5181_vm3, %v5180_v32, %v5752_v62 }
 0x55d   :  { %v5760_v14 = vpop.permute.xlu1 %5759 }
 0x55e   :  { %v5762_v42 = vunpack.i.h.bf16 %v5760_v14  ;;  %v5761_v39 = vunpack.i.l.bf16 %v5760_v14 }
 0x560   :  { %v5189_v34 = vsel %vm5186_vm4, %v5184_v22, %v5761_v39  ;;  %v5190_v29 = vsel %vm5186_vm4, %v5185_v61, %v5762_v42 }
 0x561   :  { %v5192_v0 = vpack.c.bf16 %v5190_v29, %v5189_v34 }
 0x563   :  { %5720 = vmatmul.mubr.msk.bf16.vlgmr.msra.gmra.mrb[36].mxu0 %vm72_vm0, %v5192_v0 }
 0x636   :  { %v5721_v60 = vpop.f32.mrb[36].mxu0 }
 0x637   :  { %v5265_v6 = vadd.f32 %v5721_v60, %v5446_v33  ;;  %v5256_v52 = vpop.f32.mrb[37].mxu0 }
 0x638   :  { %v5257_v38 = vadd.f32 %v5446_v33, %v5256_v52  ;;  %v5722_v59 = vpop.f32.mrb[38].mxu0 }
 0x639   :  { %5273 = vst.msk [vmem:[%s7003_s9 + $0x10] sm:$0xff] %vm72_vm0, %v5265_v6  ;;  %v5268_v1 = vadd.f32 %v5722_v59, %v5446_v33  ;;  %v5259_v35 = vpop.f32.mrb[39].mxu0 }
 0x63a   :  { %5271 = vst.msk [vmem:[%s7003_s9] sm:$0xff] %vm72_vm0, %v5257_v38  ;;  %v5260_v57 = vadd.f32 %v5446_v33, %v5259_v35 }
 0x63b   :  { %5274 = vst.msk [vmem:[%s7003_s9 + $0x18] sm:$0xff] %vm72_vm0, %v5268_v1 }
 0x63c   :  { %5272 = vst.msk [vmem:[%s7003_s9 + $0x8] sm:$0xff] %vm72_vm0, %v5260_v57 }

</bundles_post_ra>
